<compile_context>
chip_gen: v5e
topology: v5e:2x2
jax: 0.10.0
libtpu: 0.0.40
codegen_flags: <defaults>
</compile_context>

<pallas_src>
import functools

import jax
import jax.numpy as jnp
from jax.experimental import pallas as pl
from jax.experimental.pallas import tpu as pltpu


def _round_up(x, m):
    return (x + m - 1) // m * m


# --------------------------------------------------------------------------- #
# Kernel: one batch tile of the full MLP (all layers fused).
#   refs = [w0, b0, w1, b1, ..., w_last(1 x H_pad), b_last(1 x 1), o_ref]
# --------------------------------------------------------------------------- #
def _disc_mlp_kernel(x_ref, *refs):
    o_ref = refs[-1]
    params = refs[:-1]
    n_layers = len(params) // 2

    # Hidden layers: bf16 operands, f32 accumulation, bias+ReLU in f32,
    # single cast back to bf16 per layer.
    h = x_ref[...]                                        # (TILE_B, K_pad) bf16
    for li in range(n_layers - 1):
        w_ref, b_ref = params[2 * li], params[2 * li + 1]
        a = jnp.dot(h, w_ref[...], preferred_element_type=jnp.float32)
        a = jnp.maximum(a + b_ref[...], 0.0)              # bias f32, ReLU
        h = a.astype(jnp.bfloat16)                        # (TILE_B, H_pad) bf16

    # Final 1-logit layer as a VPU multiply + lane (XLU) reduction: avoids an
    # MXU pass whose output would be 127/128 padding and keeps the store to a
    # narrow (TILE_B, 1) column (tiny HBM writeback).
    wl_ref, bl_ref = params[-2], params[-1]               # (1,H_pad) bf16, (1,1) f32
    prod = h.astype(jnp.float32) * wl_ref[...].astype(jnp.float32)
    o_ref[...] = jnp.sum(prod, axis=-1, keepdims=True) + bl_ref[...]


# --------------------------------------------------------------------------- #
# Parameter construction / preparation
# --------------------------------------------------------------------------- #
def init_discriminator_params(key, input_size, num_layers=5, num_units=200):
    """Torch-like Linear params: W stored as (in, out), b as (1, out), f32."""
    layers_dim = [input_size] + [num_units] * (num_layers - 1) + [1]
    params = []
    for i in range(num_layers):
        key, wk, bk = jax.random.split(key, 3)
        fan_in, fan_out = layers_dim[i], layers_dim[i + 1]
        scale = 1.0 / float(fan_in) ** 0.5
        w = jax.random.uniform(wk, (fan_in, fan_out), jnp.float32,
                               minval=-scale, maxval=scale)
        b = jax.random.uniform(bk, (1, fan_out), jnp.float32,
                               minval=-scale, maxval=scale)
        params.append((w, b))
    return params


def prepare_params(params):
    """Zero-pad every dim to a multiple of 128 lanes, cast weights to bf16
    (biases stay f32).  The last-layer weight (fan_out == 1) is stored as a
    (1, H_pad) row so the kernel can do a VPU reduction instead of a padded
    MXU matmul.  Returns [w0, b0, w1, b1, ..., w_last_row, b_last]."""
    n = len(params)
    flat = []
    for i, (w, b) in enumerate(params):
        fan_in, fan_out = w.shape
        in_p = _round_up(fan_in, 128)
        if i < n - 1:
            out_p = _round_up(fan_out, 128)
            w_p = jnp.pad(w, ((0, in_p - fan_in), (0, out_p - fan_out)))
            b_p = jnp.pad(b, ((0, 0), (0, out_p - fan_out)))
            flat.append(w_p.astype(jnp.bfloat16))
            flat.append(b_p.astype(jnp.float32))
        else:
            assert fan_out == 1
            w_row = jnp.pad(w.T, ((0, 0), (0, in_p - fan_in)))   # (1, in_p)
            flat.append(w_row.astype(jnp.bfloat16))
            flat.append(b.astype(jnp.float32))                   # (1, 1)
    return flat


# --------------------------------------------------------------------------- #
# Batch-tile selection (128-aligned, >=2 grid steps when possible for v7x's
# two TensorCores, shrunk so the double-buffered working set fits VMEM).
# --------------------------------------------------------------------------- #
def _choose_batch_tile(B, k_pad, hid_p, w_bytes, w_buf):
    def footprint(t):
        return (2 * t * k_pad * 2          # double-buffered bf16 input tile
                + 2 * t * 4                # double-buffered f32 output column
                + w_buf * w_bytes          # resident weights/biases
                + 2 * t * hid_p * 6)       # live f32 + bf16 activations (slack)

    b128 = _round_up(B, 128)
    tile_b = min(2048, b128)
    # Keep at least 2 grid steps when the batch allows it so the "parallel"
    # batch axis can shard across both TensorCores on v7x.
    if b128 // tile_b < 2 and b128 >= 256:
        tile_b = _round_up(b128 // 2, 128)
    # Shrink if the working set would not fit comfortably (v7x: 64 MiB VMEM).
    budget = 40 * (1 << 20)
    while tile_b > 128 and footprint(tile_b) > budget:
        tile_b = max(128, _round_up(tile_b // 2, 128))
    b_pad = _round_up(B, tile_b)
    return tile_b, b_pad, footprint(tile_b)


# --------------------------------------------------------------------------- #
# Forward wrapper
# --------------------------------------------------------------------------- #
@functools.partial(jax.jit, static_argnames=("single_buffer_weights",))
def discriminator_forward(input_feature, input_attribute, flat_params,
                          single_buffer_weights=True):
    """JAX/Pallas equivalent of Discriminator.forward (bf16 MXU matmuls)."""
    B = input_feature.shape[0]
    feat = input_feature.reshape(B, -1)                  # flatten()
    attr = input_attribute.reshape(B, -1)                # flatten()
    x = jnp.concatenate([feat, attr], axis=1)            # (B, D_in) f32
    d_in = x.shape[1]

    k_pad = flat_params[0].shape[0]                      # padded input width
    hid_p = flat_params[0].shape[1]                      # padded hidden width
    w_bytes = sum(int(p.size) * p.dtype.itemsize for p in flat_params)
    w_buf = 1 if single_buffer_weights else 2

    tile_b, b_pad, fp = _choose_batch_tile(B, k_pad, hid_p, w_bytes, w_buf)
    x = jnp.pad(x, ((0, b_pad - B), (0, k_pad - d_in))).astype(jnp.bfloat16)
    grid = (b_pad // tile_b,)

    # Weight / bias blocks: full array, constant index_map (VMEM-resident),
    # single-buffered when the backend supports pl.Buffered(1).
    if single_buffer_weights:
        param_specs = [pl.BlockSpec(p.shape, lambda i: (0, 0),
                                    pipeline_mode=pl.Buffered(1))
                       for p in flat_params]
    else:
        param_specs = [pl.BlockSpec(p.shape, lambda i: (0, 0))
                       for p in flat_params]

    in_specs = [pl.BlockSpec((tile_b, k_pad), lambda i: (i, 0))] + param_specs
    out_spec = pl.BlockSpec((tile_b, 1), lambda i: (i, 0))

    # Advisory cost estimate for XLA's scheduler.
    n_layers = len(flat_params) // 2
    flops = 0
    for li in range(n_layers - 1):
        w = flat_params[2 * li]
        flops += 2 * b_pad * w.shape[0] * w.shape[1]
    flops += 2 * b_pad * flat_params[-2].shape[1]        # final VPU reduction
    bytes_accessed = int(x.size) * 2 + w_bytes + b_pad * 4
    cost = pl.CostEstimate(flops=int(flops), transcendentals=0,
                           bytes_accessed=int(bytes_accessed))

    vmem_limit = int(min(64 * (1 << 20), max(16 * (1 << 20), 2 * fp)))

    out = pl.pallas_call(
        _disc_mlp_kernel,
        out_shape=jax.ShapeDtypeStruct((b_pad, 1), jnp.float32),
        grid=grid,
        in_specs=in_specs,
        out_specs=out_spec,
        compiler_params=pltpu.CompilerParams(
            dimension_semantics=("parallel",),
            vmem_limit_bytes=vmem_limit),
        cost_estimate=cost,
    )(x, *flat_params)

    # Drop batch padding; torch.squeeze(x, 1).
    return out[:B, 0]                                    # (B,)


# --------------------------------------------------------------------------- #
# References for correctness checking
# --------------------------------------------------------------------------- #
def _reference_forward_f32(input_feature, input_attribute, params):
    """Pure-JAX f32 reference of the torch module (exact semantics)."""
    B = input_feature.shape[0]
    x = jnp.concatenate([input_feature.reshape(B, -1),
                         input_attribute.reshape(B, -1)], axis=1).astype(jnp.float32)
    n = len(params)
    for i, (w, b) in enumerate(params):
        x = x @ w + b
        if i < n - 1:
            x = jnp.maximum(x, 0.0)
    return jnp.squeeze(x, axis=1)


def _reference_forward_bf16(input_feature, input_attribute, params):
    """Precision-matched reference (bf16 operands, f32 accumulation)."""
    B = input_feature.shape[0]
    x = jnp.concatenate([input_feature.reshape(B, -1),
                         input_attribute.reshape(B, -1)], axis=1).astype(jnp.bfloat16)
    n = len(params)
    for i, (w, b) in enumerate(params):
        x = jnp.dot(x, w.astype(jnp.bfloat16),
                    preferred_element_type=jnp.float32) + b
        if i < n - 1:
            x = jnp.maximum(x, 0.0)
            x = x.astype(jnp.bfloat16)
    return jnp.squeeze(x, axis=1)


# --------------------------------------------------------------------------- #
if __name__ == "__main__":
    key = jax.random.PRNGKey(0)
    kf, ka, kp = jax.random.split(key, 3)

    # Small shapes consistent with doppelganger: feature is (B, seq, feat_dim),
    # attribute is (B, attr_dim); flattened and concatenated by the module.
    B, SEQ, FDIM, ADIM = 2, 8, 4, 16
    input_feature = jax.random.normal(kf, (B, SEQ, FDIM), jnp.float32)
    input_attribute = jax.random.normal(ka, (B, ADIM), jnp.float32)

    d_feat = SEQ * FDIM                        # 32
    input_size = d_feat + ADIM                 # 48
    num_layers, num_units = 5, 32              # small hidden for the example
    params = init_discriminator_params(kp, input_size, num_layers, num_units)
    flat_params = prepare_params(params)

    try:
        out = jax.block_until_ready(
            discriminator_forward(input_feature, input_attribute, flat_params,
                                  single_buffer_weights=True))
    except Exception:
        # Fallback for JAX builds where the Mosaic grid pipeline rejects
        # pl.Buffered(1) single-buffering on constant-index weight BlockSpecs.
        out = jax.block_until_ready(
            discriminator_forward(input_feature, input_attribute, flat_params,
                                  single_buffer_weights=False))

    ref_bf16 = _reference_forward_bf16(input_feature, input_attribute, params)
    ref_f32 = _reference_forward_f32(input_feature, input_attribute, params)

    assert out.shape == (B,), out.shape
    # Precision-matched check (same bf16 operands, f32 accumulation).
    assert jnp.allclose(out, ref_bf16, atol=1e-2, rtol=1e-2), (out, ref_bf16)
    # Semantic check vs. the exact f32 torch math (loose: bf16 operands).
    assert jnp.allclose(out, ref_f32, atol=5e-2, rtol=5e-2), (out, ref_f32)

    print("KERNEL_OK")
</pallas_src>

<mosaic_0001>
module attributes {stable_mosaic.version = 11 : i64} {
  func.func @_disc_mlp_kernel(%arg0: i32, %arg1: memref<128x128xbf16, #tpu.memory_space<vmem>>, %arg2: memref<128x128xbf16, #tpu.memory_space<vmem>>, %arg3: memref<1x128xf32, #tpu.memory_space<vmem>>, %arg4: memref<128x128xbf16, #tpu.memory_space<vmem>>, %arg5: memref<1x128xf32, #tpu.memory_space<vmem>>, %arg6: memref<128x128xbf16, #tpu.memory_space<vmem>>, %arg7: memref<1x128xf32, #tpu.memory_space<vmem>>, %arg8: memref<128x128xbf16, #tpu.memory_space<vmem>>, %arg9: memref<1x128xf32, #tpu.memory_space<vmem>>, %arg10: memref<1x128xbf16, #tpu.memory_space<vmem>>, %arg11: memref<1x1xf32, #tpu.memory_space<vmem>>, %arg12: memref<128x1xf32, #tpu.memory_space<vmem>>) attributes {dimension_semantics = [#tpu.dimension_semantics<parallel>], iteration_bounds = array<i64: 1>, scalar_prefetch = 0 : i64, scratch_operands = 0 : i64, tpu.core_type = #tpu.core_type<tc>, window_params = [{transform_indices = @transform_0, window_bounds = array<i64: 128, 128>}, {pipeline_mode = #tpu.pipeline_mode<synchronous>, transform_indices = @transform_1, window_bounds = array<i64: 128, 128>}, {pipeline_mode = #tpu.pipeline_mode<synchronous>, transform_indices = @transform_2, window_bounds = array<i64: 1, 128>}, {pipeline_mode = #tpu.pipeline_mode<synchronous>, transform_indices = @transform_3, window_bounds = array<i64: 128, 128>}, {pipeline_mode = #tpu.pipeline_mode<synchronous>, transform_indices = @transform_4, window_bounds = array<i64: 1, 128>}, {pipeline_mode = #tpu.pipeline_mode<synchronous>, transform_indices = @transform_5, window_bounds = array<i64: 128, 128>}, {pipeline_mode = #tpu.pipeline_mode<synchronous>, transform_indices = @transform_6, window_bounds = array<i64: 1, 128>}, {pipeline_mode = #tpu.pipeline_mode<synchronous>, transform_indices = @transform_7, window_bounds = array<i64: 128, 128>}, {pipeline_mode = #tpu.pipeline_mode<synchronous>, transform_indices = @transform_8, window_bounds = array<i64: 1, 128>}, {pipeline_mode = #tpu.pipeline_mode<synchronous>, transform_indices = @transform_9, window_bounds = array<i64: 1, 128>}, {pipeline_mode = #tpu.pipeline_mode<synchronous>, transform_indices = @transform_10, window_bounds = array<i64: 1, 1>}, {transform_indices = @transform_11, window_bounds = array<i64: 128, 1>}]} {
    %c0 = arith.constant 0 : index
    %c0_0 = arith.constant 0 : index
    %0 = vector.load %arg1[%c0, %c0_0] : memref<128x128xbf16, #tpu.memory_space<vmem>>, vector<128x128xbf16>
    %c0_1 = arith.constant 0 : index
    %c0_2 = arith.constant 0 : index
    %1 = vector.load %arg2[%c0_1, %c0_2] : memref<128x128xbf16, #tpu.memory_space<vmem>>, vector<128x128xbf16>
    %cst = arith.constant dense<0.000000e+00> : vector<128x128xf32>
    %2 = tpu.matmul %0, %1, %cst {dimension_numbers = #tpu.dot_dimension_numbers<[1], [0], [0], [1], [0, 0, 1, 1], [], []>} : vector<128x128xbf16>, vector<128x128xbf16>, vector<128x128xf32> -> vector<128x128xf32>
    %c0_3 = arith.constant 0 : index
    %c0_4 = arith.constant 0 : index
    %3 = vector.load %arg3[%c0_3, %c0_4] : memref<1x128xf32, #tpu.memory_space<vmem>>, vector<1x128xf32>
    %4 = vector.broadcast %3 : vector<1x128xf32> to vector<128x128xf32>
    %5 = arith.addf %2, %4 : vector<128x128xf32>
    %cst_5 = arith.constant 0.000000e+00 : f32
    %6 = vector.broadcast %cst_5 : f32 to vector<128x128xf32>
    %7 = arith.maximumf %5, %6 : vector<128x128xf32>
    %8 = arith.truncf %7 : vector<128x128xf32> to vector<128x128xbf16>
    %c0_6 = arith.constant 0 : index
    %c0_7 = arith.constant 0 : index
    %9 = vector.load %arg4[%c0_6, %c0_7] : memref<128x128xbf16, #tpu.memory_space<vmem>>, vector<128x128xbf16>
    %cst_8 = arith.constant dense<0.000000e+00> : vector<128x128xf32>
    %10 = tpu.matmul %8, %9, %cst_8 {dimension_numbers = #tpu.dot_dimension_numbers<[1], [0], [0], [1], [0, 0, 1, 1], [], []>} : vector<128x128xbf16>, vector<128x128xbf16>, vector<128x128xf32> -> vector<128x128xf32>
    %c0_9 = arith.constant 0 : index
    %c0_10 = arith.constant 0 : index
    %11 = vector.load %arg5[%c0_9, %c0_10] : memref<1x128xf32, #tpu.memory_space<vmem>>, vector<1x128xf32>
    %12 = vector.broadcast %11 : vector<1x128xf32> to vector<128x128xf32>
    %13 = arith.addf %10, %12 : vector<128x128xf32>
    %cst_11 = arith.constant 0.000000e+00 : f32
    %14 = vector.broadcast %cst_11 : f32 to vector<128x128xf32>
    %15 = arith.maximumf %13, %14 : vector<128x128xf32>
    %16 = arith.truncf %15 : vector<128x128xf32> to vector<128x128xbf16>
    %c0_12 = arith.constant 0 : index
    %c0_13 = arith.constant 0 : index
    %17 = vector.load %arg6[%c0_12, %c0_13] : memref<128x128xbf16, #tpu.memory_space<vmem>>, vector<128x128xbf16>
    %cst_14 = arith.constant dense<0.000000e+00> : vector<128x128xf32>
    %18 = tpu.matmul %16, %17, %cst_14 {dimension_numbers = #tpu.dot_dimension_numbers<[1], [0], [0], [1], [0, 0, 1, 1], [], []>} : vector<128x128xbf16>, vector<128x128xbf16>, vector<128x128xf32> -> vector<128x128xf32>
    %c0_15 = arith.constant 0 : index
    %c0_16 = arith.constant 0 : index
    %19 = vector.load %arg7[%c0_15, %c0_16] : memref<1x128xf32, #tpu.memory_space<vmem>>, vector<1x128xf32>
    %20 = vector.broadcast %19 : vector<1x128xf32> to vector<128x128xf32>
    %21 = arith.addf %18, %20 : vector<128x128xf32>
    %cst_17 = arith.constant 0.000000e+00 : f32
    %22 = vector.broadcast %cst_17 : f32 to vector<128x128xf32>
    %23 = arith.maximumf %21, %22 : vector<128x128xf32>
    %24 = arith.truncf %23 : vector<128x128xf32> to vector<128x128xbf16>
    %c0_18 = arith.constant 0 : index
    %c0_19 = arith.constant 0 : index
    %25 = vector.load %arg8[%c0_18, %c0_19] : memref<128x128xbf16, #tpu.memory_space<vmem>>, vector<128x128xbf16>
    %cst_20 = arith.constant dense<0.000000e+00> : vector<128x128xf32>
    %26 = tpu.matmul %24, %25, %cst_20 {dimension_numbers = #tpu.dot_dimension_numbers<[1], [0], [0], [1], [0, 0, 1, 1], [], []>} : vector<128x128xbf16>, vector<128x128xbf16>, vector<128x128xf32> -> vector<128x128xf32>
    %c0_21 = arith.constant 0 : index
    %c0_22 = arith.constant 0 : index
    %27 = vector.load %arg9[%c0_21, %c0_22] : memref<1x128xf32, #tpu.memory_space<vmem>>, vector<1x128xf32>
    %28 = vector.broadcast %27 : vector<1x128xf32> to vector<128x128xf32>
    %29 = arith.addf %26, %28 : vector<128x128xf32>
    %cst_23 = arith.constant 0.000000e+00 : f32
    %30 = vector.broadcast %cst_23 : f32 to vector<128x128xf32>
    %31 = arith.maximumf %29, %30 : vector<128x128xf32>
    %32 = arith.truncf %31 : vector<128x128xf32> to vector<128x128xbf16>
    %33 = arith.extf %32 : vector<128x128xbf16> to vector<128x128xf32>
    %c0_24 = arith.constant 0 : index
    %c0_25 = arith.constant 0 : index
    %34 = vector.load %arg10[%c0_24, %c0_25] : memref<1x128xbf16, #tpu.memory_space<vmem>>, vector<1x128xbf16>
    %35 = arith.extf %34 : vector<1x128xbf16> to vector<1x128xf32>
    %36 = vector.broadcast %35 : vector<1x128xf32> to vector<128x128xf32>
    %37 = arith.mulf %33, %36 : vector<128x128xf32>
    %cst_26 = arith.constant dense<0.000000e+00> : vector<128xf32>
    %38 = vector.multi_reduction <add>, %37, %cst_26 [1] : vector<128x128xf32> to vector<128xf32>
    %39 = vector.shape_cast %38 : vector<128xf32> to vector<128x1xf32>
    %c0_27 = arith.constant 0 : index
    %c0_28 = arith.constant 0 : index
    %40 = vector.load %arg11[%c0_27, %c0_28] : memref<1x1xf32, #tpu.memory_space<vmem>>, vector<1x1xf32>
    %41 = vector.broadcast %40 : vector<1x1xf32> to vector<128x1xf32>
    %42 = arith.addf %39, %41 : vector<128x1xf32>
    %c0_29 = arith.constant 0 : index
    %c0_30 = arith.constant 0 : index
    %43 = vector.load %arg12[%c0_29, %c0_30] : memref<128x1xf32, #tpu.memory_space<vmem>>, vector<128x1xf32>
    tpu.vector_store %arg12[%c0_29, %c0_30], %42 {strides = array<i32>} : memref<128x1xf32, #tpu.memory_space<vmem>>, vector<128x1xf32>,
    return
  }
  func.func @transform_0(%arg0: i32) -> (i32, i32) {
    %c0_i32 = arith.constant 0 : i32
    %c0_i32_0 = arith.constant 0 : i32
    return %arg0, %c0_i32 : i32, i32
  }
  func.func @transform_1(%arg0: i32) -> (i32, i32) {
    %c0_i32 = arith.constant 0 : i32
    %c0_i32_0 = arith.constant 0 : i32
    %c0_i32_1 = arith.constant 0 : i32
    return %c0_i32, %c0_i32_0 : i32, i32
  }
  func.func @transform_2(%arg0: i32) -> (i32, i32) {
    %c0_i32 = arith.constant 0 : i32
    %c0_i32_0 = arith.constant 0 : i32
    %c0_i32_1 = arith.constant 0 : i32
    return %c0_i32, %c0_i32_0 : i32, i32
  }
  func.func @transform_3(%arg0: i32) -> (i32, i32) {
    %c0_i32 = arith.constant 0 : i32
    %c0_i32_0 = arith.constant 0 : i32
    %c0_i32_1 = arith.constant 0 : i32
    return %c0_i32, %c0_i32_0 : i32, i32
  }
  func.func @transform_4(%arg0: i32) -> (i32, i32) {
    %c0_i32 = arith.constant 0 : i32
    %c0_i32_0 = arith.constant 0 : i32
    %c0_i32_1 = arith.constant 0 : i32
    return %c0_i32, %c0_i32_0 : i32, i32
  }
  func.func @transform_5(%arg0: i32) -> (i32, i32) {
    %c0_i32 = arith.constant 0 : i32
    %c0_i32_0 = arith.constant 0 : i32
    %c0_i32_1 = arith.constant 0 : i32
    return %c0_i32, %c0_i32_0 : i32, i32
  }
  func.func @transform_6(%arg0: i32) -> (i32, i32) {
    %c0_i32 = arith.constant 0 : i32
    %c0_i32_0 = arith.constant 0 : i32
    %c0_i32_1 = arith.constant 0 : i32
    return %c0_i32, %c0_i32_0 : i32, i32
  }
  func.func @transform_7(%arg0: i32) -> (i32, i32) {
    %c0_i32 = arith.constant 0 : i32
    %c0_i32_0 = arith.constant 0 : i32
    %c0_i32_1 = arith.constant 0 : i32
    return %c0_i32, %c0_i32_0 : i32, i32
  }
  func.func @transform_8(%arg0: i32) -> (i32, i32) {
    %c0_i32 = arith.constant 0 : i32
    %c0_i32_0 = arith.constant 0 : i32
    %c0_i32_1 = arith.constant 0 : i32
    return %c0_i32, %c0_i32_0 : i32, i32
  }
  func.func @transform_9(%arg0: i32) -> (i32, i32) {
    %c0_i32 = arith.constant 0 : i32
    %c0_i32_0 = arith.constant 0 : i32
    %c0_i32_1 = arith.constant 0 : i32
    return %c0_i32, %c0_i32_0 : i32, i32
  }
  func.func @transform_10(%arg0: i32) -> (i32, i32) {
    %c0_i32 = arith.constant 0 : i32
    %c0_i32_0 = arith.constant 0 : i32
    %c0_i32_1 = arith.constant 0 : i32
    return %c0_i32, %c0_i32_0 : i32, i32
  }
  func.func @transform_11(%arg0: i32) -> (i32, i32) {
    %c0_i32 = arith.constant 0 : i32
    %c0_i32_0 = arith.constant 0 : i32
    return %arg0, %c0_i32 : i32, i32
  }
}

module attributes {stable_mosaic.version = 11 : i64} {
  func.func @_disc_mlp_kernel(%arg0: i32, %arg1: memref<128x128xbf16, #tpu.memory_space<vmem>>, %arg2: memref<128x128xbf16, #tpu.memory_space<vmem>>, %arg3: memref<1x128xf32, #tpu.memory_space<vmem>>, %arg4: memref<128x128xbf16, #tpu.memory_space<vmem>>, %arg5: memref<1x128xf32, #tpu.memory_space<vmem>>, %arg6: memref<128x128xbf16, #tpu.memory_space<vmem>>, %arg7: memref<1x128xf32, #tpu.memory_space<vmem>>, %arg8: memref<128x128xbf16, #tpu.memory_space<vmem>>, %arg9: memref<1x128xf32, #tpu.memory_space<vmem>>, %arg10: memref<1x128xbf16, #tpu.memory_space<vmem>>, %arg11: memref<1x1xf32, #tpu.memory_space<vmem>>, %arg12: memref<128x1xf32, #tpu.memory_space<vmem>>) attributes {dimension_semantics = [#tpu.dimension_semantics<parallel>], iteration_bounds = array<i64: 1>, scalar_prefetch = 0 : i64, scratch_operands = 0 : i64, tpu.core_type = #tpu.core_type<tc>, window_params = [{transform_indices = @transform_0, window_bounds = array<i64: 128, 128>}, {pipeline_mode = #tpu.pipeline_mode<synchronous>, transform_indices = @transform_1, window_bounds = array<i64: 128, 128>}, {pipeline_mode = #tpu.pipeline_mode<synchronous>, transform_indices = @transform_2, window_bounds = array<i64: 1, 128>}, {pipeline_mode = #tpu.pipeline_mode<synchronous>, transform_indices = @transform_3, window_bounds = array<i64: 128, 128>}, {pipeline_mode = #tpu.pipeline_mode<synchronous>, transform_indices = @transform_4, window_bounds = array<i64: 1, 128>}, {pipeline_mode = #tpu.pipeline_mode<synchronous>, transform_indices = @transform_5, window_bounds = array<i64: 128, 128>}, {pipeline_mode = #tpu.pipeline_mode<synchronous>, transform_indices = @transform_6, window_bounds = array<i64: 1, 128>}, {pipeline_mode = #tpu.pipeline_mode<synchronous>, transform_indices = @transform_7, window_bounds = array<i64: 128, 128>}, {pipeline_mode = #tpu.pipeline_mode<synchronous>, transform_indices = @transform_8, window_bounds = array<i64: 1, 128>}, {pipeline_mode = #tpu.pipeline_mode<synchronous>, transform_indices = @transform_9, window_bounds = array<i64: 1, 128>}, {pipeline_mode = #tpu.pipeline_mode<synchronous>, transform_indices = @transform_10, window_bounds = array<i64: 1, 1>}, {transform_indices = @transform_11, window_bounds = array<i64: 128, 1>}]} {
    %c0 = arith.constant 0 : index
    %c0_0 = arith.constant 0 : index
    %0 = vector.load %arg1[%c0, %c0_0] : memref<128x128xbf16, #tpu.memory_space<vmem>>, vector<128x128xbf16>
    %c0_1 = arith.constant 0 : index
    %c0_2 = arith.constant 0 : index
    %1 = vector.load %arg2[%c0_1, %c0_2] : memref<128x128xbf16, #tpu.memory_space<vmem>>, vector<128x128xbf16>
    %cst = arith.constant dense<0.000000e+00> : vector<128x128xf32>
    %2 = tpu.matmul %0, %1, %cst {dimension_numbers = #tpu.dot_dimension_numbers<[1], [0], [0], [1], [0, 0, 1, 1], [], []>} : vector<128x128xbf16>, vector<128x128xbf16>, vector<128x128xf32> -> vector<128x128xf32>
    %c0_3 = arith.constant 0 : index
    %c0_4 = arith.constant 0 : index
    %3 = vector.load %arg3[%c0_3, %c0_4] : memref<1x128xf32, #tpu.memory_space<vmem>>, vector<1x128xf32>
    %4 = vector.broadcast %3 : vector<1x128xf32> to vector<128x128xf32>
    %5 = arith.addf %2, %4 : vector<128x128xf32>
    %cst_5 = arith.constant 0.000000e+00 : f32
    %6 = vector.broadcast %cst_5 : f32 to vector<128x128xf32>
    %7 = arith.maximumf %5, %6 : vector<128x128xf32>
    %8 = arith.truncf %7 : vector<128x128xf32> to vector<128x128xbf16>
    %c0_6 = arith.constant 0 : index
    %c0_7 = arith.constant 0 : index
    %9 = vector.load %arg4[%c0_6, %c0_7] : memref<128x128xbf16, #tpu.memory_space<vmem>>, vector<128x128xbf16>
    %cst_8 = arith.constant dense<0.000000e+00> : vector<128x128xf32>
    %10 = tpu.matmul %8, %9, %cst_8 {dimension_numbers = #tpu.dot_dimension_numbers<[1], [0], [0], [1], [0, 0, 1, 1], [], []>} : vector<128x128xbf16>, vector<128x128xbf16>, vector<128x128xf32> -> vector<128x128xf32>
    %c0_9 = arith.constant 0 : index
    %c0_10 = arith.constant 0 : index
    %11 = vector.load %arg5[%c0_9, %c0_10] : memref<1x128xf32, #tpu.memory_space<vmem>>, vector<1x128xf32>
    %12 = vector.broadcast %11 : vector<1x128xf32> to vector<128x128xf32>
    %13 = arith.addf %10, %12 : vector<128x128xf32>
    %cst_11 = arith.constant 0.000000e+00 : f32
    %14 = vector.broadcast %cst_11 : f32 to vector<128x128xf32>
    %15 = arith.maximumf %13, %14 : vector<128x128xf32>
    %16 = arith.truncf %15 : vector<128x128xf32> to vector<128x128xbf16>
    %c0_12 = arith.constant 0 : index
    %c0_13 = arith.constant 0 : index
    %17 = vector.load %arg6[%c0_12, %c0_13] : memref<128x128xbf16, #tpu.memory_space<vmem>>, vector<128x128xbf16>
    %cst_14 = arith.constant dense<0.000000e+00> : vector<128x128xf32>
    %18 = tpu.matmul %16, %17, %cst_14 {dimension_numbers = #tpu.dot_dimension_numbers<[1], [0], [0], [1], [0, 0, 1, 1], [], []>} : vector<128x128xbf16>, vector<128x128xbf16>, vector<128x128xf32> -> vector<128x128xf32>
    %c0_15 = arith.constant 0 : index
    %c0_16 = arith.constant 0 : index
    %19 = vector.load %arg7[%c0_15, %c0_16] : memref<1x128xf32, #tpu.memory_space<vmem>>, vector<1x128xf32>
    %20 = vector.broadcast %19 : vector<1x128xf32> to vector<128x128xf32>
    %21 = arith.addf %18, %20 : vector<128x128xf32>
    %cst_17 = arith.constant 0.000000e+00 : f32
    %22 = vector.broadcast %cst_17 : f32 to vector<128x128xf32>
    %23 = arith.maximumf %21, %22 : vector<128x128xf32>
    %24 = arith.truncf %23 : vector<128x128xf32> to vector<128x128xbf16>
    %c0_18 = arith.constant 0 : index
    %c0_19 = arith.constant 0 : index
    %25 = vector.load %arg8[%c0_18, %c0_19] : memref<128x128xbf16, #tpu.memory_space<vmem>>, vector<128x128xbf16>
    %cst_20 = arith.constant dense<0.000000e+00> : vector<128x128xf32>
    %26 = tpu.matmul %24, %25, %cst_20 {dimension_numbers = #tpu.dot_dimension_numbers<[1], [0], [0], [1], [0, 0, 1, 1], [], []>} : vector<128x128xbf16>, vector<128x128xbf16>, vector<128x128xf32> -> vector<128x128xf32>
    %c0_21 = arith.constant 0 : index
    %c0_22 = arith.constant 0 : index
    %27 = vector.load %arg9[%c0_21, %c0_22] : memref<1x128xf32, #tpu.memory_space<vmem>>, vector<1x128xf32>
    %28 = vector.broadcast %27 : vector<1x128xf32> to vector<128x128xf32>
    %29 = arith.addf %26, %28 : vector<128x128xf32>
    %cst_23 = arith.constant 0.000000e+00 : f32
    %30 = vector.broadcast %cst_23 : f32 to vector<128x128xf32>
    %31 = arith.maximumf %29, %30 : vector<128x128xf32>
    %32 = arith.truncf %31 : vector<128x128xf32> to vector<128x128xbf16>
    %33 = arith.extf %32 : vector<128x128xbf16> to vector<128x128xf32>
    %c0_24 = arith.constant 0 : index
    %c0_25 = arith.constant 0 : index
    %34 = vector.load %arg10[%c0_24, %c0_25] : memref<1x128xbf16, #tpu.memory_space<vmem>>, vector<1x128xbf16>
    %35 = arith.extf %34 : vector<1x128xbf16> to vector<1x128xf32>
    %36 = vector.broadcast %35 : vector<1x128xf32> to vector<128x128xf32>
    %37 = arith.mulf %33, %36 : vector<128x128xf32>
    %cst_26 = arith.constant dense<0.000000e+00> : vector<128xf32>
    %38 = vector.multi_reduction <add>, %37, %cst_26 [1] : vector<128x128xf32> to vector<128xf32>
    %39 = vector.shape_cast %38 : vector<128xf32> to vector<128x1xf32>
    %c0_27 = arith.constant 0 : index
    %c0_28 = arith.constant 0 : index
    %40 = vector.load %arg11[%c0_27, %c0_28] : memref<1x1xf32, #tpu.memory_space<vmem>>, vector<1x1xf32>
    %41 = vector.broadcast %40 : vector<1x1xf32> to vector<128x1xf32>
    %42 = arith.addf %39, %41 : vector<128x1xf32>
    %c0_29 = arith.constant 0 : index
    %c0_30 = arith.constant 0 : index
    %43 = vector.load %arg12[%c0_29, %c0_30] : memref<128x1xf32, #tpu.memory_space<vmem>>, vector<128x1xf32>
    tpu.vector_store %arg12[%c0_29, %c0_30], %42 {strides = array<i32>} : memref<128x1xf32, #tpu.memory_space<vmem>>, vector<128x1xf32>,
    return
  }
  func.func @transform_0(%arg0: i32) -> (i32, i32) {
    %c0_i32 = arith.constant 0 : i32
    %c0_i32_0 = arith.constant 0 : i32
    return %arg0, %c0_i32 : i32, i32
  }
  func.func @transform_1(%arg0: i32) -> (i32, i32) {
    %c0_i32 = arith.constant 0 : i32
    %c0_i32_0 = arith.constant 0 : i32
    %c0_i32_1 = arith.constant 0 : i32
    return %c0_i32, %c0_i32_0 : i32, i32
  }
  func.func @transform_2(%arg0: i32) -> (i32, i32) {
    %c0_i32 = arith.constant 0 : i32
    %c0_i32_0 = arith.constant 0 : i32
    %c0_i32_1 = arith.constant 0 : i32
    return %c0_i32, %c0_i32_0 : i32, i32
  }
  func.func @transform_3(%arg0: i32) -> (i32, i32) {
    %c0_i32 = arith.constant 0 : i32
    %c0_i32_0 = arith.constant 0 : i32
    %c0_i32_1 = arith.constant 0 : i32
    return %c0_i32, %c0_i32_0 : i32, i32
  }
  func.func @transform_4(%arg0: i32) -> (i32, i32) {
    %c0_i32 = arith.constant 0 : i32
    %c0_i32_0 = arith.constant 0 : i32
    %c0_i32_1 = arith.constant 0 : i32
    return %c0_i32, %c0_i32_0 : i32, i32
  }
  func.func @transform_5(%arg0: i32) -> (i32, i32) {
    %c0_i32 = arith.constant 0 : i32
    %c0_i32_0 = arith.constant 0 : i32
    %c0_i32_1 = arith.constant 0 : i32
    return %c0_i32, %c0_i32_0 : i32, i32
  }
  func.func @transform_6(%arg0: i32) -> (i32, i32) {
    %c0_i32 = arith.constant 0 : i32
    %c0_i32_0 = arith.constant 0 : i32
    %c0_i32_1 = arith.constant 0 : i32
    return %c0_i32, %c0_i32_0 : i32, i32
  }
  func.func @transform_7(%arg0: i32) -> (i32, i32) {
    %c0_i32 = arith.constant 0 : i32
    %c0_i32_0 = arith.constant 0 : i32
    %c0_i32_1 = arith.constant 0 : i32
    return %c0_i32, %c0_i32_0 : i32, i32
  }
  func.func @transform_8(%arg0: i32) -> (i32, i32) {
    %c0_i32 = arith.constant 0 : i32
    %c0_i32_0 = arith.constant 0 : i32
    %c0_i32_1 = arith.constant 0 : i32
    return %c0_i32, %c0_i32_0 : i32, i32
  }
  func.func @transform_9(%arg0: i32) -> (i32, i32) {
    %c0_i32 = arith.constant 0 : i32
    %c0_i32_0 = arith.constant 0 : i32
    %c0_i32_1 = arith.constant 0 : i32
    return %c0_i32, %c0_i32_0 : i32, i32
  }
  func.func @transform_10(%arg0: i32) -> (i32, i32) {
    %c0_i32 = arith.constant 0 : i32
    %c0_i32_0 = arith.constant 0 : i32
    %c0_i32_1 = arith.constant 0 : i32
    return %c0_i32, %c0_i32_0 : i32, i32
  }
  func.func @transform_11(%arg0: i32) -> (i32, i32) {
    %c0_i32 = arith.constant 0 : i32
    %c0_i32_0 = arith.constant 0 : i32
    return %arg0, %c0_i32 : i32, i32
  }
}

</mosaic_0001>

<bundles_post_ra>
// kernel: discriminator_forward.1
= control target key start
LH: loop header
LB: loop body
LE: loop exit
PB: predicated region body
PF: predicated region fallthrough
CT: control target
= control target key end

     0   :  { %s1395_s0 = inlined_call_operand.vmem [shape: bf16[128,128], index: 0, kind: input, shape index: {}]   ;;  %s1396_s1 = inlined_call_operand.vmem [shape: bf16[128,128], index: 1, kind: input, shape index: {}]   ;;  %s1397_s2 = inlined_call_operand.vmem [shape: f32[1,128], index: 2, kind: input, shape index: {}]   ;;  %s1398_s3 = inlined_call_operand.hbm [shape: bf16[128,128], index: 3, kind: input, shape index: {}]   ;;  %s1399_s4 = inlined_call_operand.vmem [shape: f32[1,128], index: 4, kind: input, shape index: {}]   ;;  %s1400_s5 = inlined_call_operand.hbm [shape: bf16[128,128], index: 5, kind: input, shape index: {}]   ;;  %s1401_s6 = inlined_call_operand.vmem [shape: f32[1,128], index: 6, kind: input, shape index: {}]   ;;  %s1402_s7 = inlined_call_operand.hbm [shape: bf16[128,128], index: 7, kind: input, shape index: {}]   ;;  %s1403_s8 = inlined_call_operand.vmem [shape: f32[1,128], index: 8, kind: input, shape index: {}]   ;;  %s1404_s9 = inlined_call_operand.vmem [shape: bf16[1,128], index: 9, kind: input, shape index: {}]   ;;  %s1405_s10 = inlined_call_operand.<no memory space> [shape: f32[1,1], index: 10, kind: input, shape index: {}]   ;;  %s1406_s11 = inlined_call_operand.vmem [shape: f32[128,1], index: 11, kind: output, shape index: {}]  }
   0x1   :  { %v16_v0 = vstv %s1405_s10 }
   0x2   :  { %17 = vst [vmem:[#allocation2] sm:$0x1] %v16_v0 }
   0x3   :  { %18 = vsyncpa [#allocation4], 0 }
   0x4   :  { %19 = vsyncpa [#allocation6], 0  ;;  %s45_s21 = sshll.u32 %s1400_s5, 4  ;;  %s1119_s22 = smov [#allocation5]   ;;  %s46_s21 = int_to_ptr.hbm [resolvable:$true] %s45_s21 }
   0x5   :  { %s47_s23 = sshll.u32 %s1119_s22, 4  ;;  %s30_s26 = sshll.u32 %s1398_s3, 4  ;;  %s48_s23 = int_to_ptr.vmem [resolvable:$true] %s47_s23  ;;  %s31_s26 = int_to_ptr.hbm [resolvable:$true] %s30_s26 }
   0x6   :  { %s1120_s27 = smov 64   ;;  %s1121_s28 = smov 4  }
   0x7   :  { %53 = dma.hbm_to_vmem [thread:$0]  %s46_s21, 1024, %s48_s23, [#allocation6], %s1120_s27, %s1120_s27, %s1121_s28  }
   0x8   :  { %s1122_s10 = smov [#allocation3]   ;;  %s60_s13 = sshll.u32 %s1402_s7, 4  ;;  %s61_s13 = int_to_ptr.hbm [resolvable:$true] %s60_s13 }
   0x9   :  { %s32_s29 = sshll.u32 %s1122_s10, 4  ;;  %s1123_s5 = smov [#allocation7]   ;;  %s33_s29 = int_to_ptr.vmem [resolvable:$true] %s32_s29 }
   0xa   :  { %38 = dma.hbm_to_vmem [thread:$0]  %s31_s26, 1024, %s33_s29, [#allocation4], %s1120_s27, %s1120_s27, %s1121_s28  }
   0xb   :  { %s62_s14 = sshll.u32 %s1123_s5, 4  ;;  %s63_s14 = int_to_ptr.vmem [resolvable:$true] %s62_s14 }
   0xc   :  { %68 = dma.hbm_to_vmem [thread:$0]  %s61_s13, 1024, %s63_s14, [#allocation6], %s1120_s27, %s1120_s27, %s1121_s28  }
   0xd   :  { %1115 = dma.done.wait [#allocation4], 1024  }
   0xe   :  { %1116 = vsyncadd [#allocation4], 4294966272 }
   0xf   :  { %1117 = dma.done.wait [#allocation6], 2048  }
  0x10   :  { %1118 = vsyncadd [#allocation6], 4294965248  ;;  %v1008_v1 = vld [vmem:[%s1396_s1 + $0x38] sm:$0xff]  ;;  %v1007_v2 = vld [vmem:[%s1396_s1 + $0x30] sm:$0xff]  ;;  %vm810_vm0 = vcmask 7168  }
  0x11   :  { %219 = vmatpush.bf16.msra.mxu0 %v1008_v1  ;;  %v1006_v3 = vld [vmem:[%s1396_s1 + $0x28] sm:$0xff]  ;;  %v1005_v4 = vld [vmem:[%s1396_s1 + $0x20] sm:$0xff]  ;;  %v1004_v5 = vld [vmem:[%s1396_s1 + $0x18] sm:$0xff] }
  0x12   :  { %v1003_v6 = vld [vmem:[%s1396_s1 + $0x10] sm:$0xff]  ;;  %v1002_v7 = vld [vmem:[%s1396_s1 + $0x8] sm:$0xff]  ;;  %v1001_v8 = vld [vmem:[%s1396_s1] sm:$0xff] }
  0x13   :  { %v993_v9 = vld [vmem:[%s1395_s0] sm:$0xff]  ;;  %v994_v10 = vld [vmem:[%s1395_s0 + $0x8] sm:$0xff]  ;;  %v995_v11 = vld [vmem:[%s1395_s0 + $0x10] sm:$0xff] }
  0x14   :  { %v996_v12 = vld [vmem:[%s1395_s0 + $0x18] sm:$0xff]  ;;  %v997_v13 = vld [vmem:[%s1395_s0 + $0x20] sm:$0xff]  ;;  %v998_v15 = vld [vmem:[%s1395_s0 + $0x28] sm:$0xff] }
  0x15   :  { %220 = vmatpush.bf16.msra.mxu0 %v1007_v2  ;;  %v1016_v14 = vld [vmem:[#allocation3 + $0x38] sm:$0xff]  ;;  %v1015_v16 = vld [vmem:[#allocation3 + $0x30] sm:$0xff]  ;;  %v1014_v17 = vld [vmem:[#allocation3 + $0x28] sm:$0xff] }
  0x16   :  { %360 = vmatpush.bf16.msra.mxu1 %v1016_v14  ;;  %v1013_v18 = vld [vmem:[#allocation3 + $0x20] sm:$0xff]  ;;  %v1012_v19 = vld [vmem:[#allocation3 + $0x18] sm:$0xff]  ;;  %v999_v20 = vld [vmem:[%s1395_s0 + $0x30] sm:$0xff] }
  0x17   :  { %v1011_v21 = vld [vmem:[#allocation3 + $0x10] sm:$0xff]  ;;  %v1010_v22 = vld [vmem:[#allocation3 + $0x8] sm:$0xff]  ;;  %v1009_v23 = vld [vmem:[#allocation3] sm:$0xff] }
  0x18   :  { %v1000_v24 = vld [vmem:[%s1395_s0 + $0x38] sm:$0xff]  ;;  %v1247_v26 = vld [vmem:[%s1397_s2] ss:$0 sm:$0xff] }
  0x19   :  { %221 = vmatpush.bf16.msra.mxu0 %v1006_v3  ;;  %v1024_v1 = vld [vmem:[#allocation5 + $0x38] sm:$0xff] }
  0x1a   :  { %361 = vmatpush.bf16.msra.mxu1 %v1015_v16  ;;  %501 = vmatpush.bf16.msra.mxu2 %v1024_v1  ;;  %v1019_v16 = vld [vmem:[#allocation5 + $0x10] sm:$0xff] }
  0x1d   :  { %222 = vmatpush.bf16.msra.mxu0 %v1005_v4 }
  0x1e   :  { %362 = vmatpush.bf16.msra.mxu1 %v1014_v17 }
  0x21   :  { %223 = vmatpush.bf16.msra.mxu0 %v1004_v5  ;;  %v1023_v5 = vld [vmem:[#allocation5 + $0x30] sm:$0xff] }
  0x22   :  { %363 = vmatpush.bf16.msra.mxu1 %v1013_v18  ;;  %502 = vmatpush.bf16.msra.mxu2 %v1023_v5  ;;  %v1018_v18 = vld [vmem:[#allocation5 + $0x8] sm:$0xff]  ;;  %v1032_v5 = vld [vmem:[#allocation7 + $0x38] sm:$0xff] }
  0x23   :  { %642 = vmatpush.bf16.msra.mxu3 %v1032_v5 }
  0x25   :  { %224 = vmatpush.bf16.msra.mxu0 %v1003_v6 }
  0x26   :  { %364 = vmatpush.bf16.msra.mxu1 %v1012_v19  ;;  %v1017_v19 = vld [vmem:[#allocation5] sm:$0xff] }
  0x29   :  { %225 = vmatpush.bf16.msra.mxu0 %v1002_v7  ;;  %v1022_v7 = vld [vmem:[#allocation5 + $0x28] sm:$0xff] }
  0x2a   :  { %365 = vmatpush.bf16.msra.mxu1 %v1011_v21  ;;  %503 = vmatpush.bf16.msra.mxu2 %v1022_v7  ;;  %v1031_v7 = vld [vmem:[#allocation7 + $0x30] sm:$0xff] }
  0x2b   :  { %643 = vmatpush.bf16.msra.mxu3 %v1031_v7 }
  0x2d   :  { %226 = vmatpush.bf16.msra.mxu0 %v1001_v8  ;;  %v1021_v8 = vld [vmem:[#allocation5 + $0x20] sm:$0xff] }
  0x2e   :  { %366 = vmatpush.bf16.msra.mxu1 %v1010_v22  ;;  %504 = vmatpush.bf16.msra.mxu2 %v1021_v8  ;;  %v1030_v8 = vld [vmem:[#allocation7 + $0x28] sm:$0xff] }
  0x2f   :  { %644 = vmatpush.bf16.msra.mxu3 %v1030_v8 }
  0x30   :  { %227 = vmatmul.bf16.vlgmr.msra.gmra.mxu0 %v993_v9 }
  0x32   :  { %367 = vmatpush.bf16.msra.mxu1 %v1009_v23 }
  0x40   :  { %232 = vmatmul.bf16.gmra.mxu0 %v994_v10 }
  0x50   :  { %237 = vmatmul.bf16.gmra.mxu0 %v995_v11 }
  0x60   :  { %242 = vmatmul.bf16.gmra.mxu0 %v996_v12  ;;  %v1020_v12 = vld [vmem:[#allocation5 + $0x18] sm:$0xff] }
  0x61   :  { %505 = vmatpush.bf16.msra.mxu2 %v1020_v12  ;;  %v1029_v12 = vld [vmem:[#allocation7 + $0x20] sm:$0xff] }
  0x62   :  { %645 = vmatpush.bf16.msra.mxu3 %v1029_v12 }
  0x65   :  { %506 = vmatpush.bf16.msra.mxu2 %v1019_v16 }
  0x69   :  { %507 = vmatpush.bf16.msra.mxu2 %v1018_v18  ;;  %v1027_v18 = vld [vmem:[#allocation7 + $0x10] sm:$0xff] }
  0x6d   :  { %508 = vmatpush.bf16.msra.mxu2 %v1017_v19 }
  0x70   :  { %247 = vmatmul.bf16.gmra.mxu0 %v997_v13 }
  0x80   :  { %252 = vmatmul.bf16.gmra.mxu0 %v998_v15 }
  0x90   :  { %257 = vmatmul.bf16.gmra.mxu0 %v999_v20 }
  0xa0   :  { %262 = vmatmul.bf16.gmra.mxu0 %v1000_v24 }
  0xad   :  { %v228_v25 = vpop.f32.mrf.mxu0 }
  0xae   :  { %v229_v27 = vadd.f32 %v1247_v26, %v228_v25 }
  0xb0   :  { %v268_v30 = vmax.f32 %v229_v27, 0.0 }
  0xb5   :  { %v230_v28 = vpop.f32.mrf.mxu0 }
  0xb6   :  { %v231_v29 = vadd.f32 %v1247_v26, %v230_v28  ;;  %v1268_v28 = vld [vmem:[%s1399_s4] ss:$0 sm:$0xff] }
  0xb8   :  { %v269_v31 = vmax.f32 %v231_v29, 0.0 }
  0xba   :  { %v284_v32 = vpack.c.bf16 %v269_v31, %v268_v30 }
  0xbc   :  { %368 = vmatmul.bf16.vlgmr.msra.gmra.mxu1 %v284_v32 }
  0xbd   :  { %v233_v33 = vpop.f32.mrf.mxu0 }
  0xbe   :  { %v234_v34 = vadd.f32 %v1247_v26, %v233_v33 }
  0xc0   :  { %v270_v37 = vmax.f32 %v234_v34, 0.0 }
  0xc5   :  { %v235_v35 = vpop.f32.mrf.mxu0 }
  0xc6   :  { %v236_v36 = vadd.f32 %v1247_v26, %v235_v35 }
  0xc8   :  { %v271_v38 = vmax.f32 %v236_v36, 0.0 }
  0xca   :  { %v285_v39 = vpack.c.bf16 %v271_v38, %v270_v37 }
  0xcc   :  { %373 = vmatmul.bf16.gmra.mxu1 %v285_v39 }
  0xcd   :  { %v238_v40 = vpop.f32.mrf.mxu0 }
  0xce   :  { %v239_v41 = vadd.f32 %v1247_v26, %v238_v40 }
  0xd0   :  { %v272_v44 = vmax.f32 %v239_v41, 0.0 }
  0xd5   :  { %v240_v42 = vpop.f32.mrf.mxu0 }
  0xd6   :  { %v241_v43 = vadd.f32 %v1247_v26, %v240_v42 }
  0xd8   :  { %v273_v45 = vmax.f32 %v241_v43, 0.0 }
  0xda   :  { %v286_v46 = vpack.c.bf16 %v273_v45, %v272_v44 }
  0xdc   :  { %378 = vmatmul.bf16.gmra.mxu1 %v286_v46 }
  0xdd   :  { %v243_v47 = vpop.f32.mrf.mxu0 }
  0xde   :  { %v244_v48 = vadd.f32 %v1247_v26, %v243_v47 }
  0xe0   :  { %v274_v51 = vmax.f32 %v244_v48, 0.0 }
  0xe5   :  { %v245_v49 = vpop.f32.mrf.mxu0 }
  0xe6   :  { %v246_v50 = vadd.f32 %v1247_v26, %v245_v49 }
  0xe8   :  { %v275_v52 = vmax.f32 %v246_v50, 0.0 }
  0xea   :  { %v287_v53 = vpack.c.bf16 %v275_v52, %v274_v51 }
  0xec   :  { %383 = vmatmul.bf16.gmra.mxu1 %v287_v53 }
  0xed   :  { %v248_v54 = vpop.f32.mrf.mxu0 }
  0xee   :  { %v249_v55 = vadd.f32 %v1247_v26, %v248_v54 }
  0xf0   :  { %v276_v58 = vmax.f32 %v249_v55, 0.0 }
  0xf5   :  { %v250_v56 = vpop.f32.mrf.mxu0 }
  0xf6   :  { %v251_v57 = vadd.f32 %v1247_v26, %v250_v56 }
  0xf8   :  { %v277_v59 = vmax.f32 %v251_v57, 0.0 }
  0xfa   :  { %v288_v60 = vpack.c.bf16 %v277_v59, %v276_v58 }
  0xfc   :  { %388 = vmatmul.bf16.gmra.mxu1 %v288_v60 }
  0xfd   :  { %v253_v61 = vpop.f32.mrf.mxu0 }
  0xfe   :  { %v254_v62 = vadd.f32 %v1247_v26, %v253_v61 }
 0x100   :  { %v278_v2 = vmax.f32 %v254_v62, 0.0 }
 0x105   :  { %v255_v63 = vpop.f32.mrf.mxu0 }
 0x106   :  { %v256_v0 = vadd.f32 %v1247_v26, %v255_v63 }
 0x108   :  { %v279_v3 = vmax.f32 %v256_v0, 0.0 }
 0x10a   :  { %v289_v4 = vpack.c.bf16 %v279_v3, %v278_v2 }
 0x10c   :  { %393 = vmatmul.bf16.gmra.mxu1 %v289_v4 }
 0x10d   :  { %v258_v6 = vpop.f32.mrf.mxu0 }
 0x10e   :  { %v259_v9 = vadd.f32 %v1247_v26, %v258_v6 }
 0x110   :  { %v280_v13 = vmax.f32 %v259_v9, 0.0 }
 0x115   :  { %v260_v10 = vpop.f32.mrf.mxu0 }
 0x116   :  { %v261_v11 = vadd.f32 %v1247_v26, %v260_v10 }
 0x118   :  { %v281_v14 = vmax.f32 %v261_v11, 0.0 }
 0x11a   :  { %v290_v15 = vpack.c.bf16 %v281_v14, %v280_v13 }
 0x11c   :  { %398 = vmatmul.bf16.gmra.mxu1 %v290_v15 }
 0x11d   :  { %v263_v17 = vpop.f32.mrf.mxu0 }
 0x11e   :  { %v264_v20 = vadd.f32 %v1247_v26, %v263_v17  ;;  %v1028_v17 = vld [vmem:[#allocation7 + $0x18] sm:$0xff] }
 0x11f   :  { %646 = vmatpush.bf16.msra.mxu3 %v1028_v17 }
 0x120   :  { %v282_v23 = vmax.f32 %v264_v20, 0.0 }
 0x123   :  { %647 = vmatpush.bf16.msra.mxu3 %v1027_v18 }
 0x125   :  { %v265_v21 = vpop.f32.mrf.mxu0 }
 0x126   :  { %v266_v22 = vadd.f32 %v1247_v26, %v265_v21  ;;  %v1026_v21 = vld [vmem:[#allocation7 + $0x8] sm:$0xff] }
 0x127   :  { %648 = vmatpush.bf16.msra.mxu3 %v1026_v21  ;;  %v739_v21 = vld [vmem:[%s1404_s9] sm:$0x1] }
 0x128   :  { %v283_v24 = vmax.f32 %v266_v22, 0.0 }
 0x12a   :  { %v291_v25 = vpack.c.bf16 %v283_v24, %v282_v23 }
 0x12c   :  { %403 = vmatmul.bf16.gmra.mxu1 %v291_v25  ;;  %v1025_v25 = vld [vmem:[#allocation7] sm:$0xff] }
 0x12d   :  { %649 = vmatpush.bf16.msra.mxu3 %v1025_v25 }
 0x139   :  { %v369_v27 = vpop.f32.mrf.mxu1 }
 0x13a   :  { %v370_v29 = vadd.f32 %v1268_v28, %v369_v27 }
 0x13c   :  { %v409_v32 = vmax.f32 %v370_v29, 0.0 }
 0x141   :  { %v371_v30 = vpop.f32.mrf.mxu1 }
 0x142   :  { %v372_v31 = vadd.f32 %v1268_v28, %v371_v30  ;;  %v1040_v30 = vld [vmem:[%s1401_s6] ss:$0 sm:$0xff] }
 0x144   :  { %v410_v33 = vmax.f32 %v372_v31, 0.0 }
 0x146   :  { %v425_v34 = vpack.c.bf16 %v410_v33, %v409_v32 }
 0x148   :  { %509 = vmatmul.bf16.vlgmr.msra.gmra.mxu2 %v425_v34 }
 0x149   :  { %v374_v26 = vpop.f32.mrf.mxu1 }
 0x14a   :  { %v375_v35 = vadd.f32 %v1268_v28, %v374_v26 }
 0x14c   :  { %v411_v38 = vmax.f32 %v375_v35, 0.0 }
 0x151   :  { %v376_v36 = vpop.f32.mrf.mxu1 }
 0x152   :  { %v377_v37 = vadd.f32 %v1268_v28, %v376_v36 }
 0x154   :  { %v412_v39 = vmax.f32 %v377_v37, 0.0 }
 0x156   :  { %v426_v40 = vpack.c.bf16 %v412_v39, %v411_v38 }
 0x158   :  { %514 = vmatmul.bf16.gmra.mxu2 %v426_v40 }
 0x159   :  { %v379_v41 = vpop.f32.mrf.mxu1 }
 0x15a   :  { %v380_v42 = vadd.f32 %v1268_v28, %v379_v41 }
 0x15c   :  { %v413_v45 = vmax.f32 %v380_v42, 0.0 }
 0x161   :  { %v381_v43 = vpop.f32.mrf.mxu1 }
 0x162   :  { %v382_v44 = vadd.f32 %v1268_v28, %v381_v43 }
 0x164   :  { %v414_v46 = vmax.f32 %v382_v44, 0.0 }
 0x166   :  { %v427_v47 = vpack.c.bf16 %v414_v46, %v413_v45 }
 0x168   :  { %519 = vmatmul.bf16.gmra.mxu2 %v427_v47 }
 0x169   :  { %v384_v48 = vpop.f32.mrf.mxu1 }
 0x16a   :  { %v385_v49 = vadd.f32 %v1268_v28, %v384_v48 }
 0x16c   :  { %v415_v52 = vmax.f32 %v385_v49, 0.0 }
 0x171   :  { %v386_v50 = vpop.f32.mrf.mxu1 }
 0x172   :  { %v387_v51 = vadd.f32 %v1268_v28, %v386_v50 }
 0x174   :  { %v416_v53 = vmax.f32 %v387_v51, 0.0 }
 0x176   :  { %v428_v54 = vpack.c.bf16 %v416_v53, %v415_v52 }
 0x178   :  { %524 = vmatmul.bf16.gmra.mxu2 %v428_v54 }
 0x179   :  { %v389_v55 = vpop.f32.mrf.mxu1 }
 0x17a   :  { %v390_v56 = vadd.f32 %v1268_v28, %v389_v55 }
 0x17c   :  { %v417_v59 = vmax.f32 %v390_v56, 0.0 }
 0x181   :  { %v391_v57 = vpop.f32.mrf.mxu1 }
 0x182   :  { %v392_v58 = vadd.f32 %v1268_v28, %v391_v57 }
 0x184   :  { %v418_v60 = vmax.f32 %v392_v58, 0.0 }
 0x186   :  { %v429_v61 = vpack.c.bf16 %v418_v60, %v417_v59 }
 0x188   :  { %529 = vmatmul.bf16.gmra.mxu2 %v429_v61 }
 0x189   :  { %v394_v62 = vpop.f32.mrf.mxu1 }
 0x18a   :  { %v395_v63 = vadd.f32 %v1268_v28, %v394_v62 }
 0x18c   :  { %v419_v2 = vmax.f32 %v395_v63, 0.0 }
 0x191   :  { %v396_v0 = vpop.f32.mrf.mxu1 }
 0x192   :  { %v397_v1 = vadd.f32 %v1268_v28, %v396_v0 }
 0x194   :  { %v420_v3 = vmax.f32 %v397_v1, 0.0 }
 0x196   :  { %v430_v4 = vpack.c.bf16 %v420_v3, %v419_v2 }
 0x198   :  { %534 = vmatmul.bf16.gmra.mxu2 %v430_v4 }
 0x199   :  { %v399_v6 = vpop.f32.mrf.mxu1 }
 0x19a   :  { %v400_v9 = vadd.f32 %v1268_v28, %v399_v6 }
 0x19c   :  { %v421_v13 = vmax.f32 %v400_v9, 0.0 }
 0x1a1   :  { %v401_v10 = vpop.f32.mrf.mxu1 }
 0x1a2   :  { %v402_v11 = vadd.f32 %v1268_v28, %v401_v10 }
 0x1a4   :  { %v422_v14 = vmax.f32 %v402_v11, 0.0 }
 0x1a6   :  { %v431_v15 = vpack.c.bf16 %v422_v14, %v421_v13 }
 0x1a8   :  { %539 = vmatmul.bf16.gmra.mxu2 %v431_v15 }
 0x1a9   :  { %v404_v16 = vpop.f32.mrf.mxu1 }
 0x1aa   :  { %v405_v19 = vadd.f32 %v1268_v28, %v404_v16 }
 0x1ac   :  { %v423_v23 = vmax.f32 %v405_v19, 0.0 }
 0x1b1   :  { %v406_v20 = vpop.f32.mrf.mxu1 }
 0x1b2   :  { %v407_v22 = vadd.f32 %v1268_v28, %v406_v20  ;;  %v1292_v20 = vld [vmem:[%s1403_s8] ss:$0 sm:$0xff] }
 0x1b4   :  { %v424_v24 = vmax.f32 %v407_v22, 0.0 }
 0x1b6   :  { %v432_v27 = vpack.c.bf16 %v424_v24, %v423_v23  ;;  %v740_v24 = vunpack.c.l.bf16 %v739_v21 }
 0x1b8   :  { %544 = vmatmul.bf16.gmra.mxu2 %v432_v27 }
 0x1cb   :  { %v510_v29 = vpop.f32.mrf.mxu2 }
 0x1cc   :  { %v511_v31 = vadd.f32 %v1040_v30, %v510_v29  ;;  %v1298_v29 = vperm.slane %v740_v24, 0 }
 0x1ce   :  { %v550_v34 = vmax.f32 %v511_v31, 0.0 }
 0x1d3   :  { %v512_v32 = vpop.f32.mrf.mxu2 }
 0x1d4   :  { %v513_v33 = vadd.f32 %v1040_v30, %v512_v32 }
 0x1d6   :  { %v551_v26 = vmax.f32 %v513_v33, 0.0 }
 0x1d8   :  { %v566_v35 = vpack.c.bf16 %v551_v26, %v550_v34 }
 0x1da   :  { %650 = vmatmul.bf16.vlgmr.msra.gmra.mxu3 %v566_v35 }
 0x1db   :  { %v515_v28 = vpop.f32.mrf.mxu2 }
 0x1dc   :  { %v516_v36 = vadd.f32 %v1040_v30, %v515_v28 }
 0x1de   :  { %v552_v39 = vmax.f32 %v516_v36, 0.0 }
 0x1e3   :  { %v517_v37 = vpop.f32.mrf.mxu2 }
 0x1e4   :  { %v518_v38 = vadd.f32 %v1040_v30, %v517_v37 }
 0x1e6   :  { %v553_v40 = vmax.f32 %v518_v38, 0.0 }
 0x1e8   :  { %v567_v41 = vpack.c.bf16 %v553_v40, %v552_v39 }
 0x1ea   :  { %655 = vmatmul.bf16.gmra.mxu3 %v567_v41 }
 0x1eb   :  { %v520_v42 = vpop.f32.mrf.mxu2 }
 0x1ec   :  { %v521_v43 = vadd.f32 %v1040_v30, %v520_v42 }
 0x1ee   :  { %v554_v46 = vmax.f32 %v521_v43, 0.0 }
 0x1f3   :  { %v522_v44 = vpop.f32.mrf.mxu2 }
 0x1f4   :  { %v523_v45 = vadd.f32 %v1040_v30, %v522_v44 }
 0x1f6   :  { %v555_v47 = vmax.f32 %v523_v45, 0.0 }
 0x1f8   :  { %v568_v48 = vpack.c.bf16 %v555_v47, %v554_v46 }
 0x1fa   :  { %660 = vmatmul.bf16.gmra.mxu3 %v568_v48 }
 0x1fb   :  { %v525_v49 = vpop.f32.mrf.mxu2 }
 0x1fc   :  { %v526_v50 = vadd.f32 %v1040_v30, %v525_v49 }
 0x1fe   :  { %v556_v53 = vmax.f32 %v526_v50, 0.0 }
 0x203   :  { %v527_v51 = vpop.f32.mrf.mxu2 }
 0x204   :  { %v528_v52 = vadd.f32 %v1040_v30, %v527_v51 }
 0x206   :  { %v557_v54 = vmax.f32 %v528_v52, 0.0 }
 0x208   :  { %v569_v55 = vpack.c.bf16 %v557_v54, %v556_v53 }
 0x20a   :  { %665 = vmatmul.bf16.gmra.mxu3 %v569_v55 }
 0x20b   :  { %v530_v56 = vpop.f32.mrf.mxu2 }
 0x20c   :  { %v531_v57 = vadd.f32 %v1040_v30, %v530_v56 }
 0x20e   :  { %v558_v60 = vmax.f32 %v531_v57, 0.0 }
 0x213   :  { %v532_v58 = vpop.f32.mrf.mxu2 }
 0x214   :  { %v533_v59 = vadd.f32 %v1040_v30, %v532_v58 }
 0x216   :  { %v559_v61 = vmax.f32 %v533_v59, 0.0 }
 0x218   :  { %v570_v62 = vpack.c.bf16 %v559_v61, %v558_v60 }
 0x21a   :  { %670 = vmatmul.bf16.gmra.mxu3 %v570_v62 }
 0x21b   :  { %v535_v63 = vpop.f32.mrf.mxu2 }
 0x21c   :  { %v536_v0 = vadd.f32 %v1040_v30, %v535_v63 }
 0x21e   :  { %v560_v3 = vmax.f32 %v536_v0, 0.0 }
 0x223   :  { %v537_v1 = vpop.f32.mrf.mxu2 }
 0x224   :  { %v538_v2 = vadd.f32 %v1040_v30, %v537_v1 }
 0x226   :  { %v561_v4 = vmax.f32 %v538_v2, 0.0 }
 0x228   :  { %v571_v5 = vpack.c.bf16 %v561_v4, %v560_v3 }
 0x22a   :  { %675 = vmatmul.bf16.gmra.mxu3 %v571_v5 }
 0x22b   :  { %v540_v6 = vpop.f32.mrf.mxu2 }
 0x22c   :  { %v541_v7 = vadd.f32 %v1040_v30, %v540_v6 }
 0x22e   :  { %v562_v10 = vmax.f32 %v541_v7, 0.0 }
 0x233   :  { %v542_v8 = vpop.f32.mrf.mxu2 }
 0x234   :  { %v543_v9 = vadd.f32 %v1040_v30, %v542_v8 }
 0x236   :  { %v563_v11 = vmax.f32 %v543_v9, 0.0 }
 0x238   :  { %v572_v12 = vpack.c.bf16 %v563_v11, %v562_v10 }
 0x23a   :  { %680 = vmatmul.bf16.gmra.mxu3 %v572_v12 }
 0x23b   :  { %v545_v13 = vpop.f32.mrf.mxu2 }
 0x23c   :  { %v546_v14 = vadd.f32 %v1040_v30, %v545_v13 }
 0x23e   :  { %v564_v17 = vmax.f32 %v546_v14, 0.0 }
 0x243   :  { %v547_v15 = vpop.f32.mrf.mxu2 }
 0x244   :  { %v548_v16 = vadd.f32 %v1040_v30, %v547_v15 }
 0x246   :  { %v565_v18 = vmax.f32 %v548_v16, 0.0 }
 0x248   :  { %v573_v19 = vpack.c.bf16 %v565_v18, %v564_v17 }
 0x24a   :  { %685 = vmatmul.bf16.gmra.mxu3 %v573_v19 }
 0x25d   :  { %v651_v22 = vpop.f32.mrf.mxu3 }
 0x25e   :  { %v652_v23 = vadd.f32 %v1292_v20, %v651_v22 }
 0x260   :  { %v691_v25 = vmax.f32 %v652_v23, 0.0 }
 0x262   :  { %v707_v27 = vpack.c.bf16 %v691_v25, %v691_v25 }
 0x264   :  { %v723_v30 = vunpack.c.l.bf16 %v707_v27 }
 0x265   :  { %v653_v31 = vpop.f32.mrf.mxu3 }
 0x266   :  { %v654_v32 = vadd.f32 %v1292_v20, %v653_v31  ;;  %v742_v33 = vmul.f32 %v1298_v29, %v723_v30 }
 0x268   :  { %v692_v34 = vmax.f32 %v654_v32, 0.0  ;;  %758 = vadd.xlane.f32.xlu0 %v742_v33 }
 0x26a   :  { %v708_v26 = vpack.c.bf16 %v692_v34, %v692_v34 }
 0x26c   :  { %v724_v35 = vunpack.c.l.bf16 %v708_v26 }
 0x26d   :  { %v656_v28 = vpop.f32.mrf.mxu3 }
 0x26e   :  { %v657_v36 = vadd.f32 %v1292_v20, %v656_v28  ;;  %v743_v37 = vmul.f32 %v1298_v29, %v724_v35 }
 0x270   :  { %v693_v38 = vmax.f32 %v657_v36, 0.0  ;;  %760 = vadd.xlane.f32.xlu0 %v743_v37 }
 0x272   :  { %v709_v39 = vpack.c.bf16 %v693_v38, %v693_v38 }
 0x274   :  { %v725_v40 = vunpack.c.l.bf16 %v709_v39 }
 0x275   :  { %v658_v41 = vpop.f32.mrf.mxu3 }
 0x276   :  { %v659_v42 = vadd.f32 %v1292_v20, %v658_v41  ;;  %v744_v43 = vmul.f32 %v1298_v29, %v725_v40 }
 0x278   :  { %v694_v44 = vmax.f32 %v659_v42, 0.0  ;;  %762 = vadd.xlane.f32.xlu1 %v744_v43 }
 0x27a   :  { %v710_v45 = vpack.c.bf16 %v694_v44, %v694_v44 }
 0x27c   :  { %v726_v46 = vunpack.c.l.bf16 %v710_v45 }
 0x27d   :  { %v661_v47 = vpop.f32.mrf.mxu3 }
 0x27e   :  { %v662_v48 = vadd.f32 %v1292_v20, %v661_v47  ;;  %v745_v49 = vmul.f32 %v1298_v29, %v726_v46 }
 0x280   :  { %v695_v50 = vmax.f32 %v662_v48, 0.0  ;;  %764 = vadd.xlane.f32.xlu1 %v745_v49 }
 0x282   :  { %v711_v51 = vpack.c.bf16 %v695_v50, %v695_v50 }
 0x284   :  { %v727_v52 = vunpack.c.l.bf16 %v711_v51 }
 0x285   :  { %v663_v53 = vpop.f32.mrf.mxu3 }
 0x286   :  { %v664_v54 = vadd.f32 %v1292_v20, %v663_v53  ;;  %v746_v55 = vmul.f32 %v1298_v29, %v727_v52 }
 0x288   :  { %v696_v56 = vmax.f32 %v664_v54, 0.0  ;;  %766 = vadd.xlane.f32.xlu2 %v746_v55  ;;  %v1042_v55 = vld [vmem:[#allocation2] ss:$0 sm:$0xff] }
 0x28a   :  { %v712_v57 = vpack.c.bf16 %v696_v56, %v696_v56 }
 0x28c   :  { %v728_v58 = vunpack.c.l.bf16 %v712_v57 }
 0x28d   :  { %v666_v59 = vpop.f32.mrf.mxu3 }
 0x28e   :  { %v667_v60 = vadd.f32 %v1292_v20, %v666_v59  ;;  %v747_v61 = vmul.f32 %v1298_v29, %v728_v58 }
 0x290   :  { %v697_v62 = vmax.f32 %v667_v60, 0.0  ;;  %768 = vadd.xlane.f32.xlu2 %v747_v61 }
 0x292   :  { %v713_v63 = vpack.c.bf16 %v697_v62, %v697_v62 }
 0x294   :  { %v729_v0 = vunpack.c.l.bf16 %v713_v63 }
 0x295   :  { %v668_v1 = vpop.f32.mrf.mxu3 }
 0x296   :  { %v669_v2 = vadd.f32 %v1292_v20, %v668_v1  ;;  %v748_v3 = vmul.f32 %v1298_v29, %v729_v0 }
 0x298   :  { %v698_v4 = vmax.f32 %v669_v2, 0.0  ;;  %770 = vadd.xlane.f32.xlu0 %v748_v3 }
 0x29a   :  { %v714_v5 = vpack.c.bf16 %v698_v4, %v698_v4 }
 0x29c   :  { %v730_v6 = vunpack.c.l.bf16 %v714_v5 }
 0x29d   :  { %v671_v7 = vpop.f32.mrf.mxu3 }
 0x29e   :  { %v672_v8 = vadd.f32 %v1292_v20, %v671_v7  ;;  %v749_v9 = vmul.f32 %v1298_v29, %v730_v6 }
 0x2a0   :  { %v699_v10 = vmax.f32 %v672_v8, 0.0  ;;  %772 = vadd.xlane.f32.xlu1 %v749_v9 }
 0x2a2   :  { %v715_v11 = vpack.c.bf16 %v699_v10, %v699_v10 }
 0x2a4   :  { %v731_v12 = vunpack.c.l.bf16 %v715_v11 }
 0x2a5   :  { %v673_v13 = vpop.f32.mrf.mxu3 }
 0x2a6   :  { %v674_v14 = vadd.f32 %v1292_v20, %v673_v13  ;;  %v750_v15 = vmul.f32 %v1298_v29, %v731_v12 }
 0x2a8   :  { %v700_v16 = vmax.f32 %v674_v14, 0.0  ;;  %774 = vadd.xlane.f32.xlu2 %v750_v15 }
 0x2aa   :  { %v716_v17 = vpack.c.bf16 %v700_v16, %v700_v16 }
 0x2ac   :  { %v732_v18 = vunpack.c.l.bf16 %v716_v17 }
 0x2ad   :  { %v676_v19 = vpop.f32.mrf.mxu3 }
 0x2ae   :  { %v677_v21 = vadd.f32 %v1292_v20, %v676_v19  ;;  %v751_v22 = vmul.f32 %v1298_v29, %v732_v18 }
 0x2b0   :  { %v701_v23 = vmax.f32 %v677_v21, 0.0  ;;  %776 = vadd.xlane.f32.xlu0 %v751_v22 }
 0x2b2   :  { %v717_v24 = vpack.c.bf16 %v701_v23, %v701_v23 }
 0x2b4   :  { %v733_v25 = vunpack.c.l.bf16 %v717_v24 }
 0x2b5   :  { %v678_v27 = vpop.f32.mrf.mxu3 }
 0x2b6   :  { %v679_v30 = vadd.f32 %v1292_v20, %v678_v27  ;;  %v752_v31 = vmul.f32 %v1298_v29, %v733_v25 }
 0x2b8   :  { %v702_v32 = vmax.f32 %v679_v30, 0.0  ;;  %778 = vadd.xlane.f32.xlu1 %v752_v31 }
 0x2ba   :  { %v718_v33 = vpack.c.bf16 %v702_v32, %v702_v32 }
 0x2bc   :  { %v734_v34 = vunpack.c.l.bf16 %v718_v33 }
 0x2bd   :  { %v681_v26 = vpop.f32.mrf.mxu3 }
 0x2be   :  { %v682_v35 = vadd.f32 %v1292_v20, %v681_v26  ;;  %v753_v28 = vmul.f32 %v1298_v29, %v734_v34 }
 0x2c0   :  { %v703_v36 = vmax.f32 %v682_v35, 0.0  ;;  %780 = vadd.xlane.f32.xlu2 %v753_v28 }
 0x2c2   :  { %v719_v37 = vpack.c.bf16 %v703_v36, %v703_v36 }
 0x2c4   :  { %v735_v38 = vunpack.c.l.bf16 %v719_v37 }
 0x2c5   :  { %v683_v39 = vpop.f32.mrf.mxu3 }
 0x2c6   :  { %v684_v40 = vadd.f32 %v1292_v20, %v683_v39  ;;  %v754_v41 = vmul.f32 %v1298_v29, %v735_v38 }
 0x2c8   :  { %v704_v42 = vmax.f32 %v684_v40, 0.0  ;;  %782 = vadd.xlane.f32.xlu0 %v754_v41 }
 0x2ca   :  { %v720_v43 = vpack.c.bf16 %v704_v42, %v704_v42 }
 0x2cc   :  { %v736_v44 = vunpack.c.l.bf16 %v720_v43 }
 0x2cd   :  { %v686_v45 = vpop.f32.mrf.mxu3 }
 0x2ce   :  { %v687_v46 = vadd.f32 %v1292_v20, %v686_v45  ;;  %v755_v47 = vmul.f32 %v1298_v29, %v736_v44 }
 0x2d0   :  { %v705_v48 = vmax.f32 %v687_v46, 0.0  ;;  %784 = vadd.xlane.f32.xlu1 %v755_v47 }
 0x2d2   :  { %v721_v49 = vpack.c.bf16 %v705_v48, %v705_v48 }
 0x2d4   :  { %v737_v50 = vunpack.c.l.bf16 %v721_v49 }
 0x2d5   :  { %v688_v51 = vpop.f32.mrf.mxu3 }
 0x2d6   :  { %v689_v52 = vadd.f32 %v1292_v20, %v688_v51  ;;  %v756_v53 = vmul.f32 %v1298_v29, %v737_v50 }
 0x2d8   :  { %v706_v54 = vmax.f32 %v689_v52, 0.0  ;;  %786 = vadd.xlane.f32.xlu2 %v756_v53 }
 0x2da   :  { %v722_v56 = vpack.c.bf16 %v706_v54, %v706_v54 }
 0x2db   :  { %v759_v57 = vpop.xlane.xlu0 %758 }
 0x2dc   :  { %v738_v58 = vunpack.c.l.bf16 %v722_v56  ;;  %v794_v59 = vadd.f32 %v1042_v55, %v759_v57 }
 0x2de   :  { %811 = vst.msk [vmem:[%s1406_s11] sm:$0xff] %vm810_vm0, %v794_v59  ;;  %v757_v60 = vmul.f32 %v1298_v29, %v738_v58 }
 0x2e0   :  { %788 = vadd.xlane.f32.xlu0 %v757_v60 }
 0x2e3   :  { %v761_v61 = vpop.xlane.xlu0 %760 }
 0x2e4   :  { %v795_v20 = vadd.f32 %v1042_v55, %v761_v61 }
 0x2e6   :  { %812 = vst.msk [vmem:[%s1406_s11 + $0x8] sm:$0xff] %vm810_vm0, %v795_v20 }
 0x2eb   :  { %v763_v62 = vpop.xlane.xlu1 %762 }
 0x2ec   :  { %v796_v63 = vadd.f32 %v1042_v55, %v763_v62 }
 0x2ee   :  { %813 = vst.msk [vmem:[%s1406_s11 + $0x10] sm:$0xff] %vm810_vm0, %v796_v63 }
 0x2f3   :  { %v765_v0 = vpop.xlane.xlu1 %764 }
 0x2f4   :  { %v797_v1 = vadd.f32 %v1042_v55, %v765_v0 }
 0x2f6   :  { %814 = vst.msk [vmem:[%s1406_s11 + $0x18] sm:$0xff] %vm810_vm0, %v797_v1 }
 0x2fb   :  { %v767_v29 = vpop.xlane.xlu2 %766 }
 0x2fc   :  { %v798_v2 = vadd.f32 %v1042_v55, %v767_v29 }
 0x2fe   :  { %815 = vst.msk [vmem:[%s1406_s11 + $0x20] sm:$0xff] %vm810_vm0, %v798_v2 }
 0x303   :  { %v769_v3 = vpop.xlane.xlu2 %768 }
 0x304   :  { %v799_v4 = vadd.f32 %v1042_v55, %v769_v3 }
 0x306   :  { %816 = vst.msk [vmem:[%s1406_s11 + $0x28] sm:$0xff] %vm810_vm0, %v799_v4 }
 0x30b   :  { %v771_v5 = vpop.xlane.xlu0 %770 }
 0x30c   :  { %v800_v6 = vadd.f32 %v1042_v55, %v771_v5 }
 0x30e   :  { %817 = vst.msk [vmem:[%s1406_s11 + $0x30] sm:$0xff] %vm810_vm0, %v800_v6 }
 0x313   :  { %v773_v7 = vpop.xlane.xlu1 %772 }
 0x314   :  { %v801_v8 = vadd.f32 %v1042_v55, %v773_v7 }
 0x316   :  { %818 = vst.msk [vmem:[%s1406_s11 + $0x38] sm:$0xff] %vm810_vm0, %v801_v8 }
 0x31b   :  { %v775_v9 = vpop.xlane.xlu2 %774 }
 0x31c   :  { %v802_v10 = vadd.f32 %v1042_v55, %v775_v9 }
 0x31e   :  { %819 = vst.msk [vmem:[%s1406_s11 + $0x40] sm:$0xff] %vm810_vm0, %v802_v10 }
 0x323   :  { %v777_v11 = vpop.xlane.xlu0 %776 }
 0x324   :  { %v803_v12 = vadd.f32 %v1042_v55, %v777_v11 }
 0x326   :  { %820 = vst.msk [vmem:[%s1406_s11 + $0x48] sm:$0xff] %vm810_vm0, %v803_v12 }
 0x32b   :  { %v779_v13 = vpop.xlane.xlu1 %778 }
 0x32c   :  { %v804_v14 = vadd.f32 %v1042_v55, %v779_v13 }
 0x32e   :  { %821 = vst.msk [vmem:[%s1406_s11 + $0x50] sm:$0xff] %vm810_vm0, %v804_v14 }
 0x333   :  { %v781_v15 = vpop.xlane.xlu2 %780 }
 0x334   :  { %v805_v16 = vadd.f32 %v1042_v55, %v781_v15 }
 0x336   :  { %822 = vst.msk [vmem:[%s1406_s11 + $0x58] sm:$0xff] %vm810_vm0, %v805_v16 }
 0x33b   :  { %v783_v17 = vpop.xlane.xlu0 %782 }
 0x33c   :  { %v806_v18 = vadd.f32 %v1042_v55, %v783_v17 }
 0x33e   :  { %823 = vst.msk [vmem:[%s1406_s11 + $0x60] sm:$0xff] %vm810_vm0, %v806_v18 }
 0x343   :  { %v785_v19 = vpop.xlane.xlu1 %784 }
 0x344   :  { %v807_v21 = vadd.f32 %v1042_v55, %v785_v19 }
 0x346   :  { %824 = vst.msk [vmem:[%s1406_s11 + $0x68] sm:$0xff] %vm810_vm0, %v807_v21 }
 0x34b   :  { %v787_v22 = vpop.xlane.xlu2 %786 }
 0x34c   :  { %v808_v23 = vadd.f32 %v1042_v55, %v787_v22 }
 0x34e   :  { %825 = vst.msk [vmem:[%s1406_s11 + $0x70] sm:$0xff] %vm810_vm0, %v808_v23 }
 0x353   :  { %v789_v24 = vpop.xlane.xlu0 %788 }
 0x354   :  { %v809_v25 = vadd.f32 %v1042_v55, %v789_v24 }
 0x356   :  { %826 = vst.msk [vmem:[%s1406_s11 + $0x78] sm:$0xff] %vm810_vm0, %v809_v25 }
 0x357   :  { %831 = vsyncpa [#allocation4], 1 }
 0x358   :  { %832 = vsyncpa [#allocation6], 1 }

// kernel: discriminator_forward.1
= control target key start
LH: loop header
LB: loop body
LE: loop exit
PB: predicated region body
PF: predicated region fallthrough
CT: control target
= control target key end

     0   :  { %s1395_s0 = inlined_call_operand.vmem [shape: bf16[128,128], index: 0, kind: input, shape index: {}]   ;;  %s1396_s1 = inlined_call_operand.vmem [shape: bf16[128,128], index: 1, kind: input, shape index: {}]   ;;  %s1397_s2 = inlined_call_operand.vmem [shape: f32[1,128], index: 2, kind: input, shape index: {}]   ;;  %s1398_s3 = inlined_call_operand.hbm [shape: bf16[128,128], index: 3, kind: input, shape index: {}]   ;;  %s1399_s4 = inlined_call_operand.vmem [shape: f32[1,128], index: 4, kind: input, shape index: {}]   ;;  %s1400_s5 = inlined_call_operand.hbm [shape: bf16[128,128], index: 5, kind: input, shape index: {}]   ;;  %s1401_s6 = inlined_call_operand.vmem [shape: f32[1,128], index: 6, kind: input, shape index: {}]   ;;  %s1402_s7 = inlined_call_operand.hbm [shape: bf16[128,128], index: 7, kind: input, shape index: {}]   ;;  %s1403_s8 = inlined_call_operand.vmem [shape: f32[1,128], index: 8, kind: input, shape index: {}]   ;;  %s1404_s9 = inlined_call_operand.vmem [shape: bf16[1,128], index: 9, kind: input, shape index: {}]   ;;  %s1405_s10 = inlined_call_operand.<no memory space> [shape: f32[1,1], index: 10, kind: input, shape index: {}]   ;;  %s1406_s11 = inlined_call_operand.vmem [shape: f32[128,1], index: 11, kind: output, shape index: {}]  }
   0x1   :  { %v16_v0 = vstv %s1405_s10 }
   0x2   :  { %17 = vst [vmem:[#allocation2] sm:$0x1] %v16_v0 }
   0x3   :  { %18 = vsyncpa [#allocation4], 0 }
   0x4   :  { %19 = vsyncpa [#allocation6], 0  ;;  %s45_s21 = sshll.u32 %s1400_s5, 4  ;;  %s1119_s22 = smov [#allocation5]   ;;  %s46_s21 = int_to_ptr.hbm [resolvable:$true] %s45_s21 }
   0x5   :  { %s47_s23 = sshll.u32 %s1119_s22, 4  ;;  %s30_s26 = sshll.u32 %s1398_s3, 4  ;;  %s48_s23 = int_to_ptr.vmem [resolvable:$true] %s47_s23  ;;  %s31_s26 = int_to_ptr.hbm [resolvable:$true] %s30_s26 }
   0x6   :  { %s1120_s27 = smov 64   ;;  %s1121_s28 = smov 4  }
   0x7   :  { %53 = dma.hbm_to_vmem [thread:$0]  %s46_s21, 1024, %s48_s23, [#allocation6], %s1120_s27, %s1120_s27, %s1121_s28  }
   0x8   :  { %s1122_s10 = smov [#allocation3]   ;;  %s60_s13 = sshll.u32 %s1402_s7, 4  ;;  %s61_s13 = int_to_ptr.hbm [resolvable:$true] %s60_s13 }
   0x9   :  { %s32_s29 = sshll.u32 %s1122_s10, 4  ;;  %s1123_s5 = smov [#allocation7]   ;;  %s33_s29 = int_to_ptr.vmem [resolvable:$true] %s32_s29 }
   0xa   :  { %38 = dma.hbm_to_vmem [thread:$0]  %s31_s26, 1024, %s33_s29, [#allocation4], %s1120_s27, %s1120_s27, %s1121_s28  }
   0xb   :  { %s62_s14 = sshll.u32 %s1123_s5, 4  ;;  %s63_s14 = int_to_ptr.vmem [resolvable:$true] %s62_s14 }
   0xc   :  { %68 = dma.hbm_to_vmem [thread:$0]  %s61_s13, 1024, %s63_s14, [#allocation6], %s1120_s27, %s1120_s27, %s1121_s28  }
   0xd   :  { %1115 = dma.done.wait [#allocation4], 1024  }
   0xe   :  { %1116 = vsyncadd [#allocation4], 4294966272 }
   0xf   :  { %1117 = dma.done.wait [#allocation6], 2048  }
  0x10   :  { %1118 = vsyncadd [#allocation6], 4294965248  ;;  %v1008_v1 = vld [vmem:[%s1396_s1 + $0x38] sm:$0xff]  ;;  %v1007_v2 = vld [vmem:[%s1396_s1 + $0x30] sm:$0xff]  ;;  %vm810_vm0 = vcmask 7168  }
  0x11   :  { %219 = vmatpush.bf16.msra.mxu0 %v1008_v1  ;;  %v1006_v3 = vld [vmem:[%s1396_s1 + $0x28] sm:$0xff]  ;;  %v1005_v4 = vld [vmem:[%s1396_s1 + $0x20] sm:$0xff]  ;;  %v1004_v5 = vld [vmem:[%s1396_s1 + $0x18] sm:$0xff] }
  0x12   :  { %v1003_v6 = vld [vmem:[%s1396_s1 + $0x10] sm:$0xff]  ;;  %v1002_v7 = vld [vmem:[%s1396_s1 + $0x8] sm:$0xff]  ;;  %v1001_v8 = vld [vmem:[%s1396_s1] sm:$0xff] }
  0x13   :  { %v993_v9 = vld [vmem:[%s1395_s0] sm:$0xff]  ;;  %v994_v10 = vld [vmem:[%s1395_s0 + $0x8] sm:$0xff]  ;;  %v995_v11 = vld [vmem:[%s1395_s0 + $0x10] sm:$0xff] }
  0x14   :  { %v996_v12 = vld [vmem:[%s1395_s0 + $0x18] sm:$0xff]  ;;  %v997_v13 = vld [vmem:[%s1395_s0 + $0x20] sm:$0xff]  ;;  %v998_v15 = vld [vmem:[%s1395_s0 + $0x28] sm:$0xff] }
  0x15   :  { %220 = vmatpush.bf16.msra.mxu0 %v1007_v2  ;;  %v1016_v14 = vld [vmem:[#allocation3 + $0x38] sm:$0xff]  ;;  %v1015_v16 = vld [vmem:[#allocation3 + $0x30] sm:$0xff]  ;;  %v1014_v17 = vld [vmem:[#allocation3 + $0x28] sm:$0xff] }
  0x16   :  { %360 = vmatpush.bf16.msra.mxu1 %v1016_v14  ;;  %v1013_v18 = vld [vmem:[#allocation3 + $0x20] sm:$0xff]  ;;  %v1012_v19 = vld [vmem:[#allocation3 + $0x18] sm:$0xff]  ;;  %v999_v20 = vld [vmem:[%s1395_s0 + $0x30] sm:$0xff] }
  0x17   :  { %v1011_v21 = vld [vmem:[#allocation3 + $0x10] sm:$0xff]  ;;  %v1010_v22 = vld [vmem:[#allocation3 + $0x8] sm:$0xff]  ;;  %v1009_v23 = vld [vmem:[#allocation3] sm:$0xff] }
  0x18   :  { %v1000_v24 = vld [vmem:[%s1395_s0 + $0x38] sm:$0xff]  ;;  %v1247_v26 = vld [vmem:[%s1397_s2] ss:$0 sm:$0xff] }
  0x19   :  { %221 = vmatpush.bf16.msra.mxu0 %v1006_v3  ;;  %v1024_v1 = vld [vmem:[#allocation5 + $0x38] sm:$0xff] }
  0x1a   :  { %361 = vmatpush.bf16.msra.mxu1 %v1015_v16  ;;  %501 = vmatpush.bf16.msra.mxu2 %v1024_v1  ;;  %v1019_v16 = vld [vmem:[#allocation5 + $0x10] sm:$0xff] }
  0x1d   :  { %222 = vmatpush.bf16.msra.mxu0 %v1005_v4 }
  0x1e   :  { %362 = vmatpush.bf16.msra.mxu1 %v1014_v17 }
  0x21   :  { %223 = vmatpush.bf16.msra.mxu0 %v1004_v5  ;;  %v1023_v5 = vld [vmem:[#allocation5 + $0x30] sm:$0xff] }
  0x22   :  { %363 = vmatpush.bf16.msra.mxu1 %v1013_v18  ;;  %502 = vmatpush.bf16.msra.mxu2 %v1023_v5  ;;  %v1018_v18 = vld [vmem:[#allocation5 + $0x8] sm:$0xff]  ;;  %v1032_v5 = vld [vmem:[#allocation7 + $0x38] sm:$0xff] }
  0x23   :  { %642 = vmatpush.bf16.msra.mxu3 %v1032_v5 }
  0x25   :  { %224 = vmatpush.bf16.msra.mxu0 %v1003_v6 }
  0x26   :  { %364 = vmatpush.bf16.msra.mxu1 %v1012_v19  ;;  %v1017_v19 = vld [vmem:[#allocation5] sm:$0xff] }
  0x29   :  { %225 = vmatpush.bf16.msra.mxu0 %v1002_v7  ;;  %v1022_v7 = vld [vmem:[#allocation5 + $0x28] sm:$0xff] }
  0x2a   :  { %365 = vmatpush.bf16.msra.mxu1 %v1011_v21  ;;  %503 = vmatpush.bf16.msra.mxu2 %v1022_v7  ;;  %v1031_v7 = vld [vmem:[#allocation7 + $0x30] sm:$0xff] }
  0x2b   :  { %643 = vmatpush.bf16.msra.mxu3 %v1031_v7 }
  0x2d   :  { %226 = vmatpush.bf16.msra.mxu0 %v1001_v8  ;;  %v1021_v8 = vld [vmem:[#allocation5 + $0x20] sm:$0xff] }
  0x2e   :  { %366 = vmatpush.bf16.msra.mxu1 %v1010_v22  ;;  %504 = vmatpush.bf16.msra.mxu2 %v1021_v8  ;;  %v1030_v8 = vld [vmem:[#allocation7 + $0x28] sm:$0xff] }
  0x2f   :  { %644 = vmatpush.bf16.msra.mxu3 %v1030_v8 }
  0x30   :  { %227 = vmatmul.bf16.vlgmr.msra.gmra.mxu0 %v993_v9 }
  0x32   :  { %367 = vmatpush.bf16.msra.mxu1 %v1009_v23 }
  0x40   :  { %232 = vmatmul.bf16.gmra.mxu0 %v994_v10 }
  0x50   :  { %237 = vmatmul.bf16.gmra.mxu0 %v995_v11 }
  0x60   :  { %242 = vmatmul.bf16.gmra.mxu0 %v996_v12  ;;  %v1020_v12 = vld [vmem:[#allocation5 + $0x18] sm:$0xff] }
  0x61   :  { %505 = vmatpush.bf16.msra.mxu2 %v1020_v12  ;;  %v1029_v12 = vld [vmem:[#allocation7 + $0x20] sm:$0xff] }
  0x62   :  { %645 = vmatpush.bf16.msra.mxu3 %v1029_v12 }
  0x65   :  { %506 = vmatpush.bf16.msra.mxu2 %v1019_v16 }
  0x69   :  { %507 = vmatpush.bf16.msra.mxu2 %v1018_v18  ;;  %v1027_v18 = vld [vmem:[#allocation7 + $0x10] sm:$0xff] }
  0x6d   :  { %508 = vmatpush.bf16.msra.mxu2 %v1017_v19 }
  0x70   :  { %247 = vmatmul.bf16.gmra.mxu0 %v997_v13 }
  0x80   :  { %252 = vmatmul.bf16.gmra.mxu0 %v998_v15 }
  0x90   :  { %257 = vmatmul.bf16.gmra.mxu0 %v999_v20 }
  0xa0   :  { %262 = vmatmul.bf16.gmra.mxu0 %v1000_v24 }
  0xad   :  { %v228_v25 = vpop.f32.mrf.mxu0 }
  0xae   :  { %v229_v27 = vadd.f32 %v1247_v26, %v228_v25 }
  0xb0   :  { %v268_v30 = vmax.f32 %v229_v27, 0.0 }
  0xb5   :  { %v230_v28 = vpop.f32.mrf.mxu0 }
  0xb6   :  { %v231_v29 = vadd.f32 %v1247_v26, %v230_v28  ;;  %v1268_v28 = vld [vmem:[%s1399_s4] ss:$0 sm:$0xff] }
  0xb8   :  { %v269_v31 = vmax.f32 %v231_v29, 0.0 }
  0xba   :  { %v284_v32 = vpack.c.bf16 %v269_v31, %v268_v30 }
  0xbc   :  { %368 = vmatmul.bf16.vlgmr.msra.gmra.mxu1 %v284_v32 }
  0xbd   :  { %v233_v33 = vpop.f32.mrf.mxu0 }
  0xbe   :  { %v234_v34 = vadd.f32 %v1247_v26, %v233_v33 }
  0xc0   :  { %v270_v37 = vmax.f32 %v234_v34, 0.0 }
  0xc5   :  { %v235_v35 = vpop.f32.mrf.mxu0 }
  0xc6   :  { %v236_v36 = vadd.f32 %v1247_v26, %v235_v35 }
  0xc8   :  { %v271_v38 = vmax.f32 %v236_v36, 0.0 }
  0xca   :  { %v285_v39 = vpack.c.bf16 %v271_v38, %v270_v37 }
  0xcc   :  { %373 = vmatmul.bf16.gmra.mxu1 %v285_v39 }
  0xcd   :  { %v238_v40 = vpop.f32.mrf.mxu0 }
  0xce   :  { %v239_v41 = vadd.f32 %v1247_v26, %v238_v40 }
  0xd0   :  { %v272_v44 = vmax.f32 %v239_v41, 0.0 }
  0xd5   :  { %v240_v42 = vpop.f32.mrf.mxu0 }
  0xd6   :  { %v241_v43 = vadd.f32 %v1247_v26, %v240_v42 }
  0xd8   :  { %v273_v45 = vmax.f32 %v241_v43, 0.0 }
  0xda   :  { %v286_v46 = vpack.c.bf16 %v273_v45, %v272_v44 }
  0xdc   :  { %378 = vmatmul.bf16.gmra.mxu1 %v286_v46 }
  0xdd   :  { %v243_v47 = vpop.f32.mrf.mxu0 }
  0xde   :  { %v244_v48 = vadd.f32 %v1247_v26, %v243_v47 }
  0xe0   :  { %v274_v51 = vmax.f32 %v244_v48, 0.0 }
  0xe5   :  { %v245_v49 = vpop.f32.mrf.mxu0 }
  0xe6   :  { %v246_v50 = vadd.f32 %v1247_v26, %v245_v49 }
  0xe8   :  { %v275_v52 = vmax.f32 %v246_v50, 0.0 }
  0xea   :  { %v287_v53 = vpack.c.bf16 %v275_v52, %v274_v51 }
  0xec   :  { %383 = vmatmul.bf16.gmra.mxu1 %v287_v53 }
  0xed   :  { %v248_v54 = vpop.f32.mrf.mxu0 }
  0xee   :  { %v249_v55 = vadd.f32 %v1247_v26, %v248_v54 }
  0xf0   :  { %v276_v58 = vmax.f32 %v249_v55, 0.0 }
  0xf5   :  { %v250_v56 = vpop.f32.mrf.mxu0 }
  0xf6   :  { %v251_v57 = vadd.f32 %v1247_v26, %v250_v56 }
  0xf8   :  { %v277_v59 = vmax.f32 %v251_v57, 0.0 }
  0xfa   :  { %v288_v60 = vpack.c.bf16 %v277_v59, %v276_v58 }
  0xfc   :  { %388 = vmatmul.bf16.gmra.mxu1 %v288_v60 }
  0xfd   :  { %v253_v61 = vpop.f32.mrf.mxu0 }
  0xfe   :  { %v254_v62 = vadd.f32 %v1247_v26, %v253_v61 }
 0x100   :  { %v278_v2 = vmax.f32 %v254_v62, 0.0 }
 0x105   :  { %v255_v63 = vpop.f32.mrf.mxu0 }
 0x106   :  { %v256_v0 = vadd.f32 %v1247_v26, %v255_v63 }
 0x108   :  { %v279_v3 = vmax.f32 %v256_v0, 0.0 }
 0x10a   :  { %v289_v4 = vpack.c.bf16 %v279_v3, %v278_v2 }
 0x10c   :  { %393 = vmatmul.bf16.gmra.mxu1 %v289_v4 }
 0x10d   :  { %v258_v6 = vpop.f32.mrf.mxu0 }
 0x10e   :  { %v259_v9 = vadd.f32 %v1247_v26, %v258_v6 }
 0x110   :  { %v280_v13 = vmax.f32 %v259_v9, 0.0 }
 0x115   :  { %v260_v10 = vpop.f32.mrf.mxu0 }
 0x116   :  { %v261_v11 = vadd.f32 %v1247_v26, %v260_v10 }
 0x118   :  { %v281_v14 = vmax.f32 %v261_v11, 0.0 }
 0x11a   :  { %v290_v15 = vpack.c.bf16 %v281_v14, %v280_v13 }
 0x11c   :  { %398 = vmatmul.bf16.gmra.mxu1 %v290_v15 }
 0x11d   :  { %v263_v17 = vpop.f32.mrf.mxu0 }
 0x11e   :  { %v264_v20 = vadd.f32 %v1247_v26, %v263_v17  ;;  %v1028_v17 = vld [vmem:[#allocation7 + $0x18] sm:$0xff] }
 0x11f   :  { %646 = vmatpush.bf16.msra.mxu3 %v1028_v17 }
 0x120   :  { %v282_v23 = vmax.f32 %v264_v20, 0.0 }
 0x123   :  { %647 = vmatpush.bf16.msra.mxu3 %v1027_v18 }
 0x125   :  { %v265_v21 = vpop.f32.mrf.mxu0 }
 0x126   :  { %v266_v22 = vadd.f32 %v1247_v26, %v265_v21  ;;  %v1026_v21 = vld [vmem:[#allocation7 + $0x8] sm:$0xff] }
 0x127   :  { %648 = vmatpush.bf16.msra.mxu3 %v1026_v21  ;;  %v739_v21 = vld [vmem:[%s1404_s9] sm:$0x1] }
 0x128   :  { %v283_v24 = vmax.f32 %v266_v22, 0.0 }
 0x12a   :  { %v291_v25 = vpack.c.bf16 %v283_v24, %v282_v23 }
 0x12c   :  { %403 = vmatmul.bf16.gmra.mxu1 %v291_v25  ;;  %v1025_v25 = vld [vmem:[#allocation7] sm:$0xff] }
 0x12d   :  { %649 = vmatpush.bf16.msra.mxu3 %v1025_v25 }
 0x139   :  { %v369_v27 = vpop.f32.mrf.mxu1 }
 0x13a   :  { %v370_v29 = vadd.f32 %v1268_v28, %v369_v27 }
 0x13c   :  { %v409_v32 = vmax.f32 %v370_v29, 0.0 }
 0x141   :  { %v371_v30 = vpop.f32.mrf.mxu1 }
 0x142   :  { %v372_v31 = vadd.f32 %v1268_v28, %v371_v30  ;;  %v1040_v30 = vld [vmem:[%s1401_s6] ss:$0 sm:$0xff] }
 0x144   :  { %v410_v33 = vmax.f32 %v372_v31, 0.0 }
 0x146   :  { %v425_v34 = vpack.c.bf16 %v410_v33, %v409_v32 }
 0x148   :  { %509 = vmatmul.bf16.vlgmr.msra.gmra.mxu2 %v425_v34 }
 0x149   :  { %v374_v26 = vpop.f32.mrf.mxu1 }
 0x14a   :  { %v375_v35 = vadd.f32 %v1268_v28, %v374_v26 }
 0x14c   :  { %v411_v38 = vmax.f32 %v375_v35, 0.0 }
 0x151   :  { %v376_v36 = vpop.f32.mrf.mxu1 }
 0x152   :  { %v377_v37 = vadd.f32 %v1268_v28, %v376_v36 }
 0x154   :  { %v412_v39 = vmax.f32 %v377_v37, 0.0 }
 0x156   :  { %v426_v40 = vpack.c.bf16 %v412_v39, %v411_v38 }
 0x158   :  { %514 = vmatmul.bf16.gmra.mxu2 %v426_v40 }
 0x159   :  { %v379_v41 = vpop.f32.mrf.mxu1 }
 0x15a   :  { %v380_v42 = vadd.f32 %v1268_v28, %v379_v41 }
 0x15c   :  { %v413_v45 = vmax.f32 %v380_v42, 0.0 }
 0x161   :  { %v381_v43 = vpop.f32.mrf.mxu1 }
 0x162   :  { %v382_v44 = vadd.f32 %v1268_v28, %v381_v43 }
 0x164   :  { %v414_v46 = vmax.f32 %v382_v44, 0.0 }
 0x166   :  { %v427_v47 = vpack.c.bf16 %v414_v46, %v413_v45 }
 0x168   :  { %519 = vmatmul.bf16.gmra.mxu2 %v427_v47 }
 0x169   :  { %v384_v48 = vpop.f32.mrf.mxu1 }
 0x16a   :  { %v385_v49 = vadd.f32 %v1268_v28, %v384_v48 }
 0x16c   :  { %v415_v52 = vmax.f32 %v385_v49, 0.0 }
 0x171   :  { %v386_v50 = vpop.f32.mrf.mxu1 }
 0x172   :  { %v387_v51 = vadd.f32 %v1268_v28, %v386_v50 }
 0x174   :  { %v416_v53 = vmax.f32 %v387_v51, 0.0 }
 0x176   :  { %v428_v54 = vpack.c.bf16 %v416_v53, %v415_v52 }
 0x178   :  { %524 = vmatmul.bf16.gmra.mxu2 %v428_v54 }
 0x179   :  { %v389_v55 = vpop.f32.mrf.mxu1 }
 0x17a   :  { %v390_v56 = vadd.f32 %v1268_v28, %v389_v55 }
 0x17c   :  { %v417_v59 = vmax.f32 %v390_v56, 0.0 }
 0x181   :  { %v391_v57 = vpop.f32.mrf.mxu1 }
 0x182   :  { %v392_v58 = vadd.f32 %v1268_v28, %v391_v57 }
 0x184   :  { %v418_v60 = vmax.f32 %v392_v58, 0.0 }
 0x186   :  { %v429_v61 = vpack.c.bf16 %v418_v60, %v417_v59 }
 0x188   :  { %529 = vmatmul.bf16.gmra.mxu2 %v429_v61 }
 0x189   :  { %v394_v62 = vpop.f32.mrf.mxu1 }
 0x18a   :  { %v395_v63 = vadd.f32 %v1268_v28, %v394_v62 }
 0x18c   :  { %v419_v2 = vmax.f32 %v395_v63, 0.0 }
 0x191   :  { %v396_v0 = vpop.f32.mrf.mxu1 }
 0x192   :  { %v397_v1 = vadd.f32 %v1268_v28, %v396_v0 }
 0x194   :  { %v420_v3 = vmax.f32 %v397_v1, 0.0 }
 0x196   :  { %v430_v4 = vpack.c.bf16 %v420_v3, %v419_v2 }
 0x198   :  { %534 = vmatmul.bf16.gmra.mxu2 %v430_v4 }
 0x199   :  { %v399_v6 = vpop.f32.mrf.mxu1 }
 0x19a   :  { %v400_v9 = vadd.f32 %v1268_v28, %v399_v6 }
 0x19c   :  { %v421_v13 = vmax.f32 %v400_v9, 0.0 }
 0x1a1   :  { %v401_v10 = vpop.f32.mrf.mxu1 }
 0x1a2   :  { %v402_v11 = vadd.f32 %v1268_v28, %v401_v10 }
 0x1a4   :  { %v422_v14 = vmax.f32 %v402_v11, 0.0 }
 0x1a6   :  { %v431_v15 = vpack.c.bf16 %v422_v14, %v421_v13 }
 0x1a8   :  { %539 = vmatmul.bf16.gmra.mxu2 %v431_v15 }
 0x1a9   :  { %v404_v16 = vpop.f32.mrf.mxu1 }
 0x1aa   :  { %v405_v19 = vadd.f32 %v1268_v28, %v404_v16 }
 0x1ac   :  { %v423_v23 = vmax.f32 %v405_v19, 0.0 }
 0x1b1   :  { %v406_v20 = vpop.f32.mrf.mxu1 }
 0x1b2   :  { %v407_v22 = vadd.f32 %v1268_v28, %v406_v20  ;;  %v1292_v20 = vld [vmem:[%s1403_s8] ss:$0 sm:$0xff] }
 0x1b4   :  { %v424_v24 = vmax.f32 %v407_v22, 0.0 }
 0x1b6   :  { %v432_v27 = vpack.c.bf16 %v424_v24, %v423_v23  ;;  %v740_v24 = vunpack.c.l.bf16 %v739_v21 }
 0x1b8   :  { %544 = vmatmul.bf16.gmra.mxu2 %v432_v27 }
 0x1cb   :  { %v510_v29 = vpop.f32.mrf.mxu2 }
 0x1cc   :  { %v511_v31 = vadd.f32 %v1040_v30, %v510_v29  ;;  %v1298_v29 = vperm.slane %v740_v24, 0 }
 0x1ce   :  { %v550_v34 = vmax.f32 %v511_v31, 0.0 }
 0x1d3   :  { %v512_v32 = vpop.f32.mrf.mxu2 }
 0x1d4   :  { %v513_v33 = vadd.f32 %v1040_v30, %v512_v32 }
 0x1d6   :  { %v551_v26 = vmax.f32 %v513_v33, 0.0 }
 0x1d8   :  { %v566_v35 = vpack.c.bf16 %v551_v26, %v550_v34 }
 0x1da   :  { %650 = vmatmul.bf16.vlgmr.msra.gmra.mxu3 %v566_v35 }
 0x1db   :  { %v515_v28 = vpop.f32.mrf.mxu2 }
 0x1dc   :  { %v516_v36 = vadd.f32 %v1040_v30, %v515_v28 }
 0x1de   :  { %v552_v39 = vmax.f32 %v516_v36, 0.0 }
 0x1e3   :  { %v517_v37 = vpop.f32.mrf.mxu2 }
 0x1e4   :  { %v518_v38 = vadd.f32 %v1040_v30, %v517_v37 }
 0x1e6   :  { %v553_v40 = vmax.f32 %v518_v38, 0.0 }
 0x1e8   :  { %v567_v41 = vpack.c.bf16 %v553_v40, %v552_v39 }
 0x1ea   :  { %655 = vmatmul.bf16.gmra.mxu3 %v567_v41 }
 0x1eb   :  { %v520_v42 = vpop.f32.mrf.mxu2 }
 0x1ec   :  { %v521_v43 = vadd.f32 %v1040_v30, %v520_v42 }
 0x1ee   :  { %v554_v46 = vmax.f32 %v521_v43, 0.0 }
 0x1f3   :  { %v522_v44 = vpop.f32.mrf.mxu2 }
 0x1f4   :  { %v523_v45 = vadd.f32 %v1040_v30, %v522_v44 }
 0x1f6   :  { %v555_v47 = vmax.f32 %v523_v45, 0.0 }
 0x1f8   :  { %v568_v48 = vpack.c.bf16 %v555_v47, %v554_v46 }
 0x1fa   :  { %660 = vmatmul.bf16.gmra.mxu3 %v568_v48 }
 0x1fb   :  { %v525_v49 = vpop.f32.mrf.mxu2 }
 0x1fc   :  { %v526_v50 = vadd.f32 %v1040_v30, %v525_v49 }
 0x1fe   :  { %v556_v53 = vmax.f32 %v526_v50, 0.0 }
 0x203   :  { %v527_v51 = vpop.f32.mrf.mxu2 }
 0x204   :  { %v528_v52 = vadd.f32 %v1040_v30, %v527_v51 }
 0x206   :  { %v557_v54 = vmax.f32 %v528_v52, 0.0 }
 0x208   :  { %v569_v55 = vpack.c.bf16 %v557_v54, %v556_v53 }
 0x20a   :  { %665 = vmatmul.bf16.gmra.mxu3 %v569_v55 }
 0x20b   :  { %v530_v56 = vpop.f32.mrf.mxu2 }
 0x20c   :  { %v531_v57 = vadd.f32 %v1040_v30, %v530_v56 }
 0x20e   :  { %v558_v60 = vmax.f32 %v531_v57, 0.0 }
 0x213   :  { %v532_v58 = vpop.f32.mrf.mxu2 }
 0x214   :  { %v533_v59 = vadd.f32 %v1040_v30, %v532_v58 }
 0x216   :  { %v559_v61 = vmax.f32 %v533_v59, 0.0 }
 0x218   :  { %v570_v62 = vpack.c.bf16 %v559_v61, %v558_v60 }
 0x21a   :  { %670 = vmatmul.bf16.gmra.mxu3 %v570_v62 }
 0x21b   :  { %v535_v63 = vpop.f32.mrf.mxu2 }
 0x21c   :  { %v536_v0 = vadd.f32 %v1040_v30, %v535_v63 }
 0x21e   :  { %v560_v3 = vmax.f32 %v536_v0, 0.0 }
 0x223   :  { %v537_v1 = vpop.f32.mrf.mxu2 }
 0x224   :  { %v538_v2 = vadd.f32 %v1040_v30, %v537_v1 }
 0x226   :  { %v561_v4 = vmax.f32 %v538_v2, 0.0 }
 0x228   :  { %v571_v5 = vpack.c.bf16 %v561_v4, %v560_v3 }
 0x22a   :  { %675 = vmatmul.bf16.gmra.mxu3 %v571_v5 }
 0x22b   :  { %v540_v6 = vpop.f32.mrf.mxu2 }
 0x22c   :  { %v541_v7 = vadd.f32 %v1040_v30, %v540_v6 }
 0x22e   :  { %v562_v10 = vmax.f32 %v541_v7, 0.0 }
 0x233   :  { %v542_v8 = vpop.f32.mrf.mxu2 }
 0x234   :  { %v543_v9 = vadd.f32 %v1040_v30, %v542_v8 }
 0x236   :  { %v563_v11 = vmax.f32 %v543_v9, 0.0 }
 0x238   :  { %v572_v12 = vpack.c.bf16 %v563_v11, %v562_v10 }
 0x23a   :  { %680 = vmatmul.bf16.gmra.mxu3 %v572_v12 }
 0x23b   :  { %v545_v13 = vpop.f32.mrf.mxu2 }
 0x23c   :  { %v546_v14 = vadd.f32 %v1040_v30, %v545_v13 }
 0x23e   :  { %v564_v17 = vmax.f32 %v546_v14, 0.0 }
 0x243   :  { %v547_v15 = vpop.f32.mrf.mxu2 }
 0x244   :  { %v548_v16 = vadd.f32 %v1040_v30, %v547_v15 }
 0x246   :  { %v565_v18 = vmax.f32 %v548_v16, 0.0 }
 0x248   :  { %v573_v19 = vpack.c.bf16 %v565_v18, %v564_v17 }
 0x24a   :  { %685 = vmatmul.bf16.gmra.mxu3 %v573_v19 }
 0x25d   :  { %v651_v22 = vpop.f32.mrf.mxu3 }
 0x25e   :  { %v652_v23 = vadd.f32 %v1292_v20, %v651_v22 }
 0x260   :  { %v691_v25 = vmax.f32 %v652_v23, 0.0 }
 0x262   :  { %v707_v27 = vpack.c.bf16 %v691_v25, %v691_v25 }
 0x264   :  { %v723_v30 = vunpack.c.l.bf16 %v707_v27 }
 0x265   :  { %v653_v31 = vpop.f32.mrf.mxu3 }
 0x266   :  { %v654_v32 = vadd.f32 %v1292_v20, %v653_v31  ;;  %v742_v33 = vmul.f32 %v1298_v29, %v723_v30 }
 0x268   :  { %v692_v34 = vmax.f32 %v654_v32, 0.0  ;;  %758 = vadd.xlane.f32.xlu0 %v742_v33 }
 0x26a   :  { %v708_v26 = vpack.c.bf16 %v692_v34, %v692_v34 }
 0x26c   :  { %v724_v35 = vunpack.c.l.bf16 %v708_v26 }
 0x26d   :  { %v656_v28 = vpop.f32.mrf.mxu3 }
 0x26e   :  { %v657_v36 = vadd.f32 %v1292_v20, %v656_v28  ;;  %v743_v37 = vmul.f32 %v1298_v29, %v724_v35 }
 0x270   :  { %v693_v38 = vmax.f32 %v657_v36, 0.0  ;;  %760 = vadd.xlane.f32.xlu0 %v743_v37 }
 0x272   :  { %v709_v39 = vpack.c.bf16 %v693_v38, %v693_v38 }
 0x274   :  { %v725_v40 = vunpack.c.l.bf16 %v709_v39 }
 0x275   :  { %v658_v41 = vpop.f32.mrf.mxu3 }
 0x276   :  { %v659_v42 = vadd.f32 %v1292_v20, %v658_v41  ;;  %v744_v43 = vmul.f32 %v1298_v29, %v725_v40 }
 0x278   :  { %v694_v44 = vmax.f32 %v659_v42, 0.0  ;;  %762 = vadd.xlane.f32.xlu1 %v744_v43 }
 0x27a   :  { %v710_v45 = vpack.c.bf16 %v694_v44, %v694_v44 }
 0x27c   :  { %v726_v46 = vunpack.c.l.bf16 %v710_v45 }
 0x27d   :  { %v661_v47 = vpop.f32.mrf.mxu3 }
 0x27e   :  { %v662_v48 = vadd.f32 %v1292_v20, %v661_v47  ;;  %v745_v49 = vmul.f32 %v1298_v29, %v726_v46 }
 0x280   :  { %v695_v50 = vmax.f32 %v662_v48, 0.0  ;;  %764 = vadd.xlane.f32.xlu1 %v745_v49 }
 0x282   :  { %v711_v51 = vpack.c.bf16 %v695_v50, %v695_v50 }
 0x284   :  { %v727_v52 = vunpack.c.l.bf16 %v711_v51 }
 0x285   :  { %v663_v53 = vpop.f32.mrf.mxu3 }
 0x286   :  { %v664_v54 = vadd.f32 %v1292_v20, %v663_v53  ;;  %v746_v55 = vmul.f32 %v1298_v29, %v727_v52 }
 0x288   :  { %v696_v56 = vmax.f32 %v664_v54, 0.0  ;;  %766 = vadd.xlane.f32.xlu2 %v746_v55  ;;  %v1042_v55 = vld [vmem:[#allocation2] ss:$0 sm:$0xff] }
 0x28a   :  { %v712_v57 = vpack.c.bf16 %v696_v56, %v696_v56 }
 0x28c   :  { %v728_v58 = vunpack.c.l.bf16 %v712_v57 }
 0x28d   :  { %v666_v59 = vpop.f32.mrf.mxu3 }
 0x28e   :  { %v667_v60 = vadd.f32 %v1292_v20, %v666_v59  ;;  %v747_v61 = vmul.f32 %v1298_v29, %v728_v58 }
 0x290   :  { %v697_v62 = vmax.f32 %v667_v60, 0.0  ;;  %768 = vadd.xlane.f32.xlu2 %v747_v61 }
 0x292   :  { %v713_v63 = vpack.c.bf16 %v697_v62, %v697_v62 }
 0x294   :  { %v729_v0 = vunpack.c.l.bf16 %v713_v63 }
 0x295   :  { %v668_v1 = vpop.f32.mrf.mxu3 }
 0x296   :  { %v669_v2 = vadd.f32 %v1292_v20, %v668_v1  ;;  %v748_v3 = vmul.f32 %v1298_v29, %v729_v0 }
 0x298   :  { %v698_v4 = vmax.f32 %v669_v2, 0.0  ;;  %770 = vadd.xlane.f32.xlu0 %v748_v3 }
 0x29a   :  { %v714_v5 = vpack.c.bf16 %v698_v4, %v698_v4 }
 0x29c   :  { %v730_v6 = vunpack.c.l.bf16 %v714_v5 }
 0x29d   :  { %v671_v7 = vpop.f32.mrf.mxu3 }
 0x29e   :  { %v672_v8 = vadd.f32 %v1292_v20, %v671_v7  ;;  %v749_v9 = vmul.f32 %v1298_v29, %v730_v6 }
 0x2a0   :  { %v699_v10 = vmax.f32 %v672_v8, 0.0  ;;  %772 = vadd.xlane.f32.xlu1 %v749_v9 }
 0x2a2   :  { %v715_v11 = vpack.c.bf16 %v699_v10, %v699_v10 }
 0x2a4   :  { %v731_v12 = vunpack.c.l.bf16 %v715_v11 }
 0x2a5   :  { %v673_v13 = vpop.f32.mrf.mxu3 }
 0x2a6   :  { %v674_v14 = vadd.f32 %v1292_v20, %v673_v13  ;;  %v750_v15 = vmul.f32 %v1298_v29, %v731_v12 }
 0x2a8   :  { %v700_v16 = vmax.f32 %v674_v14, 0.0  ;;  %774 = vadd.xlane.f32.xlu2 %v750_v15 }
 0x2aa   :  { %v716_v17 = vpack.c.bf16 %v700_v16, %v700_v16 }
 0x2ac   :  { %v732_v18 = vunpack.c.l.bf16 %v716_v17 }
 0x2ad   :  { %v676_v19 = vpop.f32.mrf.mxu3 }
 0x2ae   :  { %v677_v21 = vadd.f32 %v1292_v20, %v676_v19  ;;  %v751_v22 = vmul.f32 %v1298_v29, %v732_v18 }
 0x2b0   :  { %v701_v23 = vmax.f32 %v677_v21, 0.0  ;;  %776 = vadd.xlane.f32.xlu0 %v751_v22 }
 0x2b2   :  { %v717_v24 = vpack.c.bf16 %v701_v23, %v701_v23 }
 0x2b4   :  { %v733_v25 = vunpack.c.l.bf16 %v717_v24 }
 0x2b5   :  { %v678_v27 = vpop.f32.mrf.mxu3 }
 0x2b6   :  { %v679_v30 = vadd.f32 %v1292_v20, %v678_v27  ;;  %v752_v31 = vmul.f32 %v1298_v29, %v733_v25 }
 0x2b8   :  { %v702_v32 = vmax.f32 %v679_v30, 0.0  ;;  %778 = vadd.xlane.f32.xlu1 %v752_v31 }
 0x2ba   :  { %v718_v33 = vpack.c.bf16 %v702_v32, %v702_v32 }
 0x2bc   :  { %v734_v34 = vunpack.c.l.bf16 %v718_v33 }
 0x2bd   :  { %v681_v26 = vpop.f32.mrf.mxu3 }
 0x2be   :  { %v682_v35 = vadd.f32 %v1292_v20, %v681_v26  ;;  %v753_v28 = vmul.f32 %v1298_v29, %v734_v34 }
 0x2c0   :  { %v703_v36 = vmax.f32 %v682_v35, 0.0  ;;  %780 = vadd.xlane.f32.xlu2 %v753_v28 }
 0x2c2   :  { %v719_v37 = vpack.c.bf16 %v703_v36, %v703_v36 }
 0x2c4   :  { %v735_v38 = vunpack.c.l.bf16 %v719_v37 }
 0x2c5   :  { %v683_v39 = vpop.f32.mrf.mxu3 }
 0x2c6   :  { %v684_v40 = vadd.f32 %v1292_v20, %v683_v39  ;;  %v754_v41 = vmul.f32 %v1298_v29, %v735_v38 }
 0x2c8   :  { %v704_v42 = vmax.f32 %v684_v40, 0.0  ;;  %782 = vadd.xlane.f32.xlu0 %v754_v41 }
 0x2ca   :  { %v720_v43 = vpack.c.bf16 %v704_v42, %v704_v42 }
 0x2cc   :  { %v736_v44 = vunpack.c.l.bf16 %v720_v43 }
 0x2cd   :  { %v686_v45 = vpop.f32.mrf.mxu3 }
 0x2ce   :  { %v687_v46 = vadd.f32 %v1292_v20, %v686_v45  ;;  %v755_v47 = vmul.f32 %v1298_v29, %v736_v44 }
 0x2d0   :  { %v705_v48 = vmax.f32 %v687_v46, 0.0  ;;  %784 = vadd.xlane.f32.xlu1 %v755_v47 }
 0x2d2   :  { %v721_v49 = vpack.c.bf16 %v705_v48, %v705_v48 }
 0x2d4   :  { %v737_v50 = vunpack.c.l.bf16 %v721_v49 }
 0x2d5   :  { %v688_v51 = vpop.f32.mrf.mxu3 }
 0x2d6   :  { %v689_v52 = vadd.f32 %v1292_v20, %v688_v51  ;;  %v756_v53 = vmul.f32 %v1298_v29, %v737_v50 }
 0x2d8   :  { %v706_v54 = vmax.f32 %v689_v52, 0.0  ;;  %786 = vadd.xlane.f32.xlu2 %v756_v53 }
 0x2da   :  { %v722_v56 = vpack.c.bf16 %v706_v54, %v706_v54 }
 0x2db   :  { %v759_v57 = vpop.xlane.xlu0 %758 }
 0x2dc   :  { %v738_v58 = vunpack.c.l.bf16 %v722_v56  ;;  %v794_v59 = vadd.f32 %v1042_v55, %v759_v57 }
 0x2de   :  { %811 = vst.msk [vmem:[%s1406_s11] sm:$0xff] %vm810_vm0, %v794_v59  ;;  %v757_v60 = vmul.f32 %v1298_v29, %v738_v58 }
 0x2e0   :  { %788 = vadd.xlane.f32.xlu0 %v757_v60 }
 0x2e3   :  { %v761_v61 = vpop.xlane.xlu0 %760 }
 0x2e4   :  { %v795_v20 = vadd.f32 %v1042_v55, %v761_v61 }
 0x2e6   :  { %812 = vst.msk [vmem:[%s1406_s11 + $0x8] sm:$0xff] %vm810_vm0, %v795_v20 }
 0x2eb   :  { %v763_v62 = vpop.xlane.xlu1 %762 }
 0x2ec   :  { %v796_v63 = vadd.f32 %v1042_v55, %v763_v62 }
 0x2ee   :  { %813 = vst.msk [vmem:[%s1406_s11 + $0x10] sm:$0xff] %vm810_vm0, %v796_v63 }
 0x2f3   :  { %v765_v0 = vpop.xlane.xlu1 %764 }
 0x2f4   :  { %v797_v1 = vadd.f32 %v1042_v55, %v765_v0 }
 0x2f6   :  { %814 = vst.msk [vmem:[%s1406_s11 + $0x18] sm:$0xff] %vm810_vm0, %v797_v1 }
 0x2fb   :  { %v767_v29 = vpop.xlane.xlu2 %766 }
 0x2fc   :  { %v798_v2 = vadd.f32 %v1042_v55, %v767_v29 }
 0x2fe   :  { %815 = vst.msk [vmem:[%s1406_s11 + $0x20] sm:$0xff] %vm810_vm0, %v798_v2 }
 0x303   :  { %v769_v3 = vpop.xlane.xlu2 %768 }
 0x304   :  { %v799_v4 = vadd.f32 %v1042_v55, %v769_v3 }
 0x306   :  { %816 = vst.msk [vmem:[%s1406_s11 + $0x28] sm:$0xff] %vm810_vm0, %v799_v4 }
 0x30b   :  { %v771_v5 = vpop.xlane.xlu0 %770 }
 0x30c   :  { %v800_v6 = vadd.f32 %v1042_v55, %v771_v5 }
 0x30e   :  { %817 = vst.msk [vmem:[%s1406_s11 + $0x30] sm:$0xff] %vm810_vm0, %v800_v6 }
 0x313   :  { %v773_v7 = vpop.xlane.xlu1 %772 }
 0x314   :  { %v801_v8 = vadd.f32 %v1042_v55, %v773_v7 }
 0x316   :  { %818 = vst.msk [vmem:[%s1406_s11 + $0x38] sm:$0xff] %vm810_vm0, %v801_v8 }
 0x31b   :  { %v775_v9 = vpop.xlane.xlu2 %774 }
 0x31c   :  { %v802_v10 = vadd.f32 %v1042_v55, %v775_v9 }
 0x31e   :  { %819 = vst.msk [vmem:[%s1406_s11 + $0x40] sm:$0xff] %vm810_vm0, %v802_v10 }
 0x323   :  { %v777_v11 = vpop.xlane.xlu0 %776 }
 0x324   :  { %v803_v12 = vadd.f32 %v1042_v55, %v777_v11 }
 0x326   :  { %820 = vst.msk [vmem:[%s1406_s11 + $0x48] sm:$0xff] %vm810_vm0, %v803_v12 }
 0x32b   :  { %v779_v13 = vpop.xlane.xlu1 %778 }
 0x32c   :  { %v804_v14 = vadd.f32 %v1042_v55, %v779_v13 }
 0x32e   :  { %821 = vst.msk [vmem:[%s1406_s11 + $0x50] sm:$0xff] %vm810_vm0, %v804_v14 }
 0x333   :  { %v781_v15 = vpop.xlane.xlu2 %780 }
 0x334   :  { %v805_v16 = vadd.f32 %v1042_v55, %v781_v15 }
 0x336   :  { %822 = vst.msk [vmem:[%s1406_s11 + $0x58] sm:$0xff] %vm810_vm0, %v805_v16 }
 0x33b   :  { %v783_v17 = vpop.xlane.xlu0 %782 }
 0x33c   :  { %v806_v18 = vadd.f32 %v1042_v55, %v783_v17 }
 0x33e   :  { %823 = vst.msk [vmem:[%s1406_s11 + $0x60] sm:$0xff] %vm810_vm0, %v806_v18 }
 0x343   :  { %v785_v19 = vpop.xlane.xlu1 %784 }
 0x344   :  { %v807_v21 = vadd.f32 %v1042_v55, %v785_v19 }
 0x346   :  { %824 = vst.msk [vmem:[%s1406_s11 + $0x68] sm:$0xff] %vm810_vm0, %v807_v21 }
 0x34b   :  { %v787_v22 = vpop.xlane.xlu2 %786 }
 0x34c   :  { %v808_v23 = vadd.f32 %v1042_v55, %v787_v22 }
 0x34e   :  { %825 = vst.msk [vmem:[%s1406_s11 + $0x70] sm:$0xff] %vm810_vm0, %v808_v23 }
 0x353   :  { %v789_v24 = vpop.xlane.xlu0 %788 }
 0x354   :  { %v809_v25 = vadd.f32 %v1042_v55, %v789_v24 }
 0x356   :  { %826 = vst.msk [vmem:[%s1406_s11 + $0x78] sm:$0xff] %vm810_vm0, %v809_v25 }
 0x357   :  { %831 = vsyncpa [#allocation4], 1 }
 0x358   :  { %832 = vsyncpa [#allocation6], 1 }

</bundles_post_ra>
